<compile_context>
chip_gen: v7x
topology: tpu7x:2x2x1
jax: 0.10.0
libtpu: 0.0.40
codegen_flags: <defaults>
</compile_context>

<pallas_src>
import functools

import numpy as np

import jax
import jax.numpy as jnp
from jax.experimental import pallas as pl
from jax.experimental.pallas import tpu as pltpu


# ----------------------------------------------------------------------------
# One-time probes (run outside jit, cached per process).
# ----------------------------------------------------------------------------
@functools.lru_cache(maxsize=None)
def _get_roll_mode():
    """Determine pltpu.roll's rotation convention on this backend.

    Returns +1 if pltpu.roll matches jnp.roll (out[p] = in[(p - shift) % n]),
    -1 if it is the reversed convention, and 0 if unavailable (fall back to a
    slice+concat rotation).
    """
    try:
        x_np = np.arange(8 * 256, dtype=np.float32).reshape(8, 256)

        def probe_kernel(x_ref, o_ref):
            o_ref[...] = pltpu.roll(x_ref[...], shift=17, axis=1)

        y = pl.pallas_call(
            probe_kernel,
            out_shape=jax.ShapeDtypeStruct((8, 256), jnp.float32),
        )(jnp.asarray(x_np))
        y_np = np.asarray(jax.device_get(y))
        if np.array_equal(y_np, np.roll(x_np, 17, axis=1)):
            return 1
        if np.array_equal(y_np, np.roll(x_np, -17, axis=1)):
            return -1
    except Exception:
        pass
    return 0


@functools.lru_cache(maxsize=None)
def _vmem_capacity_bytes():
    """Per-TensorCore VMEM capacity in bytes (conservative 64 MiB fallback)."""
    try:
        info = pltpu.get_tpu_info()
        for attr in ("vmem_capacity_bytes", "vmem_size_bytes", "vmem_bytes"):
            v = getattr(info, attr, None)
            if v:
                return int(v)
    except Exception:
        pass
    return 64 * 1024 * 1024  # v7x per-TC physical VMEM (smallest generation)


def _shift_cols(x, s, length, mode):
    """Cyclic column shift: returns y with y[:, p] = x[:, (p + s) % length]."""
    s = s % length
    if s == 0:
        return x
    if mode == 1:        # pltpu.roll == jnp.roll
        return pltpu.roll(x, shift=length - s, axis=1)
    if mode == -1:       # reversed convention
        return pltpu.roll(x, shift=s, axis=1)
    # Fallback: explicit rotation via lane slices + concat.
    return jnp.concatenate([x[:, s:], x[:, :s]], axis=1)


# ----------------------------------------------------------------------------
# Parameter packing (BN folding, per-tap weight layout, halo masks).
# ----------------------------------------------------------------------------
def _round_up(v, m):
    return (v + m - 1) // m * m


def _sublane_multiple(dtype):
    # Sub-32-bit dtypes pack along sublanes: f32 -> 8, bf16 -> 16, int8 -> 32.
    return max(8, 32 // np.dtype(dtype).itemsize)


def _fold_bn(conv_b, gamma, beta, mean, var, eps=1e-5):
    scale = gamma / jnp.sqrt(var + eps)
    bias = beta + (conv_b - mean) * scale
    return scale, bias


def _pack_conv_weights(w_hwio, scale, cin_p, cout_p, dtype):
    """(3,3,cin,cout) HWIO weight + per-out-channel BN scale -> (9, cout_p, cin_p).

    Tap t = ky*3 + kx, matching the (oy, ox) = (t//3-1, t%3-1) shifts applied
    to the activation inside the kernel.
    """
    kh, kw, cin, cout = w_hwio.shape
    w = jnp.transpose(w_hwio, (0, 1, 3, 2)) * scale[None, None, :, None]
    w = w.reshape(kh * kw, cout, cin)
    wp = jnp.zeros((kh * kw, cout_p, cin_p), jnp.float32)
    wp = wp.at[:, :cout, :cin].set(w)
    return wp.astype(dtype)


def _pack_bias(bias, c_p):
    return jnp.zeros((c_p, 1), jnp.float32).at[:bias.shape[0], 0].set(bias)


def _tap_masks(h, w, b_blk):
    """(9, b_blk*h*w) 0/1 masks: zero-padding halo per 3x3 tap, tiled per image.

    These masks also zero every lane whose rolled source would come from a
    neighbouring image in the fused batch block (those are exactly the
    out-of-image positions), so rolling across the whole flat axis is safe.
    """
    rows = np.arange(h).reshape(h, 1)
    cols = np.arange(w).reshape(1, w)
    masks = np.zeros((9, h * w), np.float32)
    for t in range(9):
        oy, ox = t // 3 - 1, t % 3 - 1
        m = ((rows + oy >= 0) & (rows + oy < h) &
             (cols + ox >= 0) & (cols + ox < w))
        masks[t] = m.astype(np.float32).reshape(-1)
    return np.tile(masks, (1, b_blk))


# ----------------------------------------------------------------------------
# Fused DoubleConv Pallas kernel.
# ----------------------------------------------------------------------------
def _double_conv_pallas(x_flat, masks, w1, b1, w2, b2, *, width, roll_mode,
                        out_dtype, lanes_per_block):
    cin_p, total_lanes = x_flat.shape
    _, cmid_p, _ = w1.shape
    _, cout_p, _ = w2.shape
    mm_dtype = x_flat.dtype
    lb = lanes_per_block
    num_blocks = total_lanes // lb

    def kernel(x_ref, m_ref, w1_ref, b1_ref, w2_ref, b2_ref, o_ref):
        masks_v = m_ref[...]                                    # (9, lb)

        def conv_stage(act, w_ref, b_col):
            # act: (C_in, lb) in the matmul dtype.
            # 3x3 conv = 9 accumulating per-tap matmuls (no im2col temporary).
            acc = None
            for t in range(9):
                oy, ox = t // 3 - 1, t % 3 - 1
                if oy == 0 and ox == 0:
                    tap = act                                    # centre tap
                else:
                    shifted = _shift_cols(act, oy * width + ox, lb, roll_mode)
                    tap = shifted * masks_v[t:t + 1, :]
                part = jnp.dot(w_ref[t], tap,
                               preferred_element_type=jnp.float32)
                acc = part if acc is None else acc + part
            # Folded-BN bias + ReLU epilogue stays in f32 (VPU-friendly on v5e).
            return jnp.maximum(acc + b_col, 0.0)

        x = x_ref[...]                                           # (cin_p, lb)
        h1 = conv_stage(x, w1_ref, b1_ref[...])                  # (cmid_p, lb) f32
        h2 = conv_stage(h1.astype(mm_dtype), w2_ref, b2_ref[...])
        o_ref[...] = h2.astype(o_ref.dtype)                      # lane-dense store

    # VMEM budget: double-buffered blocks + in-kernel temporaries (+ headroom),
    # capped well below the physical per-core capacity.
    mm_b = np.dtype(mm_dtype).itemsize
    out_b = np.dtype(out_dtype).itemsize
    block_bytes = 2 * (cin_p * lb * mm_b
                       + 9 * lb * mm_b
                       + 9 * cmid_p * max(cin_p, 128) * mm_b
                       + 9 * cout_p * max(cmid_p, 128) * mm_b
                       + (cmid_p + cout_p) * 128 * 4
                       + cout_p * lb * out_b)
    tmp_bytes = (3 * cin_p * lb * mm_b + 3 * cmid_p * lb * mm_b
                 + 2 * cmid_p * lb * 4 + 2 * cout_p * lb * 4)
    cap = max(16 * 1024 * 1024, int(_vmem_capacity_bytes() * 3 // 4))
    vmem_limit = int(min(cap, max(16 * 1024 * 1024,
                                  block_bytes + tmp_bytes + (4 << 20))))

    return pl.pallas_call(
        kernel,
        out_shape=jax.ShapeDtypeStruct((cout_p, total_lanes), out_dtype),
        grid=(num_blocks,),
        in_specs=[
            pl.BlockSpec((cin_p, lb), lambda i: (0, i)),
            pl.BlockSpec((9, lb), lambda i: (0, 0)),
            pl.BlockSpec((9, cmid_p, cin_p), lambda i: (0, 0, 0)),
            pl.BlockSpec((cmid_p, 1), lambda i: (0, 0)),
            pl.BlockSpec((9, cout_p, cmid_p), lambda i: (0, 0, 0)),
            pl.BlockSpec((cout_p, 1), lambda i: (0, 0)),
        ],
        out_specs=pl.BlockSpec((cout_p, lb), lambda i: (0, i)),
        compiler_params=pltpu.CompilerParams(
            dimension_semantics=("parallel",),
            vmem_limit_bytes=vmem_limit,
        ),
    )(x_flat, masks, w1, b1, w2, b2)


@functools.partial(jax.jit, static_argnums=(2, 3))
def _double_conv_impl(x_nchw, params, roll_mode, mm_dtype):
    n, cin, h, w = x_nchw.shape
    cmid = params["w1"].shape[-1]
    cout = params["w2"].shape[-1]
    length = h * w
    out_dtype = x_nchw.dtype
    mm_dtype = np.dtype(mm_dtype)

    mult = _sublane_multiple(mm_dtype)
    cin_p, cmid_p, cout_p = (_round_up(c, mult) for c in (cin, cmid, cout))

    # ---- batch-block selection: fatten the lane axis of every grid step ----
    target_lanes = 2048
    b_blk = max(1, min(n, -(-target_lanes // length)))
    cap = max(16 * 1024 * 1024, int(_vmem_capacity_bytes() * 3 // 4))

    def _step_bytes(b):
        lanes = b * length
        return lanes * (3 * cin_p * mm_dtype.itemsize
                        + 5 * cmid_p * 4 + 3 * cout_p * 4
                        + 9 * mm_dtype.itemsize)

    while b_blk > 1 and _step_bytes(b_blk) > cap // 2:
        b_blk -= 1
    while n % b_blk != 0:
        b_blk -= 1
    if n // b_blk > 1 and (b_blk * length) % 128 != 0:
        b_blk = n   # single whole-array lane block (exempt from 128-divisibility)
    lanes_per_block = b_blk * length

    # ---- fold eval-mode BatchNorm into the conv weights / per-channel bias --
    s1, b1f = _fold_bn(params["b1"], *params["bn1"])
    s2, b2f = _fold_bn(params["b2"], *params["bn2"])
    w1 = _pack_conv_weights(params["w1"], s1, cin_p, cmid_p, mm_dtype)
    w2 = _pack_conv_weights(params["w2"], s2, cmid_p, cout_p, mm_dtype)
    b1c = _pack_bias(b1f, cmid_p)
    b2c = _pack_bias(b2f, cout_p)

    masks = jnp.asarray(_tap_masks(h, w, b_blk), dtype=mm_dtype)

    # NCHW -> channels on sublanes, (batch, spatial) flattened on lanes:
    # (N, C, H, W) -> (C, N*H*W), channel-padded to the sublane multiple.
    x_flat = jnp.transpose(x_nchw.reshape(n, cin, length), (1, 0, 2))
    x_flat = x_flat.reshape(cin, n * length)
    if cin_p != cin:
        x_flat = jnp.pad(x_flat, ((0, cin_p - cin), (0, 0)))
    x_flat = x_flat.astype(mm_dtype)

    out = _double_conv_pallas(x_flat, masks, w1, b1c, w2, b2c,
                              width=w, roll_mode=roll_mode,
                              out_dtype=out_dtype,
                              lanes_per_block=lanes_per_block)

    out = out[:cout].reshape(cout, n, length)
    return jnp.transpose(out, (1, 0, 2)).reshape(n, cout, h, w)


def double_conv(x_nchw, params, matmul_dtype=None):
    """Matches DoubleConv.forward: (conv3x3 -> BN(eval) -> ReLU) * 2, NCHW in/out.

    matmul_dtype: optional dtype for the MXU operands (e.g. jnp.bfloat16 on
    v6e/v7x).  Defaults to the input dtype; accumulation is always f32.
    Note: with a non-f32 matmul_dtype, the mid activation is re-quantized to
    that dtype between the two stages (extra precision loss vs. fp32 PyTorch).
    """
    mm_dtype = np.dtype(x_nchw.dtype if matmul_dtype is None else matmul_dtype)
    _vmem_capacity_bytes()               # warm the cached hardware query
    return _double_conv_impl(x_nchw, params, _get_roll_mode(), mm_dtype)


# ----------------------------------------------------------------------------
# Parameter init (shapes matching the PyTorch module) + pure-JAX reference.
# ----------------------------------------------------------------------------
def init_double_conv_params(key, in_channels, out_channels, mid_channels=None):
    if mid_channels is None:
        mid_channels = out_channels
    ks = jax.random.split(key, 12)

    def conv_params(kw, kb, cin, cout):
        fan_in = cin * 9
        w = jax.random.normal(kw, (3, 3, cin, cout), jnp.float32) / jnp.sqrt(fan_in)
        b = 0.1 * jax.random.normal(kb, (cout,), jnp.float32)
        return w, b

    def bn_params(kg, kb, km, kv, c):
        gamma = 1.0 + 0.1 * jax.random.normal(kg, (c,), jnp.float32)
        beta = 0.1 * jax.random.normal(kb, (c,), jnp.float32)
        mean = 0.1 * jax.random.normal(km, (c,), jnp.float32)
        var = 1.0 + 0.1 * jnp.abs(jax.random.normal(kv, (c,), jnp.float32))
        return gamma, beta, mean, var

    w1, b1 = conv_params(ks[0], ks[1], in_channels, mid_channels)
    bn1 = bn_params(ks[2], ks[3], ks[4], ks[5], mid_channels)
    w2, b2 = conv_params(ks[6], ks[7], mid_channels, out_channels)
    bn2 = bn_params(ks[8], ks[9], ks[10], ks[11], out_channels)
    return {"w1": w1, "b1": b1, "bn1": bn1, "w2": w2, "b2": b2, "bn2": bn2}


def _reference_double_conv(x_nchw, params, eps=1e-5):
    """Pure-JAX (XLA) reference: conv3x3 -> BN(eval) -> ReLU, twice."""
    def stage(x, w_hwio, b, bn):
        gamma, beta, mean, var = bn
        y = jax.lax.conv_general_dilated(
            x, w_hwio, window_strides=(1, 1), padding=((1, 1), (1, 1)),
            dimension_numbers=("NCHW", "HWIO", "NCHW"),
            precision=jax.lax.Precision.HIGHEST)
        y = y + b[None, :, None, None]
        inv = (gamma / jnp.sqrt(var + eps))[None, :, None, None]
        y = (y - mean[None, :, None, None]) * inv + beta[None, :, None, None]
        return jnp.maximum(y, 0.0)

    h = stage(x_nchw, params["w1"], params["b1"], params["bn1"])
    return stage(h, params["w2"], params["b2"], params["bn2"])


if __name__ == "__main__":
    key = jax.random.PRNGKey(0)
    k_x, k_p = jax.random.split(key)

    N, Cin, H, W = 2, 4, 16, 16
    Cout = 8

    x = jax.random.normal(k_x, (N, Cin, H, W), jnp.float32)
    params = init_double_conv_params(k_p, Cin, Cout)

    # f32 operands (default path).
    y = jax.block_until_ready(double_conv(x, params))
    assert y.shape == (N, Cout, H, W), y.shape

    ref = _reference_double_conv(x, params)
    # Tolerance covers possible reduced-precision f32 MXU passes; structural /
    # BN-folding bugs would be O(0.1-1).
    err = float(jnp.max(jnp.abs(y - ref)))
    assert err < 1e-2, f"f32 kernel/reference mismatch: max abs err = {err}"

    # bf16 MXU-operand path (the v6e/v7x compute lever); looser tolerance.
    y_bf16 = jax.block_until_ready(double_conv(x, params, matmul_dtype=jnp.bfloat16))
    err_bf16 = float(jnp.max(jnp.abs(y_bf16 - ref)))
    assert err_bf16 < 1e-1, f"bf16 kernel/reference mismatch: max abs err = {err_bf16}"

    print("KERNEL_OK")
</pallas_src>

<mosaic_0001>
module attributes {stable_mosaic.version = 11 : i64} {
  func.func @probe_kernel(%arg0: memref<8x256xf32, #tpu.memory_space<vmem>>, %arg1: memref<8x256xf32, #tpu.memory_space<vmem>>) attributes {dimension_semantics = [], scalar_prefetch = 0 : i64, scratch_operands = 0 : i64, tpu.core_type = #tpu.core_type<tc>} {
    %c0 = arith.constant 0 : index
    %c0_0 = arith.constant 0 : index
    %0 = vector.load %arg0[%c0, %c0_0] : memref<8x256xf32, #tpu.memory_space<vmem>>, vector<8x256xf32>
    %c17_i32 = arith.constant 17 : i32
    %1 = tpu.dynamic_rotate %0 by %c17_i32 dim 1 : vector<8x256xf32>, i32 -> vector<8x256xf32>
    %c0_1 = arith.constant 0 : index
    %c0_2 = arith.constant 0 : index
    %2 = vector.load %arg1[%c0_1, %c0_2] : memref<8x256xf32, #tpu.memory_space<vmem>>, vector<8x256xf32>
    tpu.vector_store %arg1[%c0_1, %c0_2], %1 {strides = array<i32>} : memref<8x256xf32, #tpu.memory_space<vmem>>, vector<8x256xf32>,
    return
  }
}

module attributes {stable_mosaic.version = 11 : i64} {
  func.func @kernel(%arg0: i32, %arg1: memref<8x512xf32, #tpu.memory_space<vmem>>, %arg2: memref<9x512xf32, #tpu.memory_space<vmem>>, %arg3: memref<9x8x8xf32, #tpu.memory_space<vmem>>, %arg4: memref<8x1xf32, #tpu.memory_space<vmem>>, %arg5: memref<9x8x8xf32, #tpu.memory_space<vmem>>, %arg6: memref<8x1xf32, #tpu.memory_space<vmem>>, %arg7: memref<8x512xf32, #tpu.memory_space<vmem>>) attributes {dimension_semantics = [#tpu.dimension_semantics<parallel>], iteration_bounds = array<i64: 1>, scalar_prefetch = 0 : i64, scratch_operands = 0 : i64, tpu.core_type = #tpu.core_type<tc>, window_params = [{transform_indices = @transform_0, window_bounds = array<i64: 8, 512>}, {pipeline_mode = #tpu.pipeline_mode<synchronous>, transform_indices = @transform_1, window_bounds = array<i64: 9, 512>}, {pipeline_mode = #tpu.pipeline_mode<synchronous>, transform_indices = @transform_2, window_bounds = array<i64: 9, 8, 8>}, {pipeline_mode = #tpu.pipeline_mode<synchronous>, transform_indices = @transform_3, window_bounds = array<i64: 8, 1>}, {pipeline_mode = #tpu.pipeline_mode<synchronous>, transform_indices = @transform_4, window_bounds = array<i64: 9, 8, 8>}, {pipeline_mode = #tpu.pipeline_mode<synchronous>, transform_indices = @transform_5, window_bounds = array<i64: 8, 1>}, {transform_indices = @transform_6, window_bounds = array<i64: 8, 512>}]} {
    %c0 = arith.constant 0 : index
    %c0_0 = arith.constant 0 : index
    %0 = vector.load %arg2[%c0, %c0_0] : memref<9x512xf32, #tpu.memory_space<vmem>>, vector<9x512xf32>
    %c0_1 = arith.constant 0 : index
    %c0_2 = arith.constant 0 : index
    %1 = vector.load %arg1[%c0_1, %c0_2] : memref<8x512xf32, #tpu.memory_space<vmem>>, vector<8x512xf32>
    %c0_3 = arith.constant 0 : index
    %c0_4 = arith.constant 0 : index
    %2 = vector.load %arg4[%c0_3, %c0_4] : memref<8x1xf32, #tpu.memory_space<vmem>>, vector<8x1xf32>
    %3 = vector.extract_strided_slice %1 {offsets = [0, 495], sizes = [8, 17], strides = [1, 1]} : vector<8x512xf32> to vector<8x17xf32>
    %4 = vector.extract_strided_slice %1 {offsets = [0, 0], sizes = [8, 495], strides = [1, 1]} : vector<8x512xf32> to vector<8x495xf32>
    %5 = tpu.concatenate %3, %4 in 1 : vector<8x17xf32>, vector<8x495xf32> -> vector<8x512xf32>
    %6 = vector.extract_strided_slice %0 {offsets = [0, 0], sizes = [1, 512], strides = [1, 1]} : vector<9x512xf32> to vector<1x512xf32>
    %7 = vector.broadcast %6 : vector<1x512xf32> to vector<8x512xf32>
    %8 = arith.mulf %5, %7 : vector<8x512xf32>
    %c0_5 = arith.constant 0 : index
    %c0_6 = arith.constant 0 : index
    %c0_7 = arith.constant 0 : index
    %9 = vector.load %arg3[%c0_5, %c0_6, %c0_7] : memref<9x8x8xf32, #tpu.memory_space<vmem>>, vector<1x8x8xf32>
    %10 = vector.shape_cast %9 : vector<1x8x8xf32> to vector<8x8xf32>
    %cst = arith.constant dense<0.000000e+00> : vector<8x512xf32>
    %11 = tpu.matmul %10, %8, %cst {dimension_numbers = #tpu.dot_dimension_numbers<[1], [0], [0], [1], [0, 0, 1, 1], [], []>} : vector<8x8xf32>, vector<8x512xf32>, vector<8x512xf32> -> vector<8x512xf32>
    %12 = vector.extract_strided_slice %1 {offsets = [0, 496], sizes = [8, 16], strides = [1, 1]} : vector<8x512xf32> to vector<8x16xf32>
    %13 = vector.extract_strided_slice %1 {offsets = [0, 0], sizes = [8, 496], strides = [1, 1]} : vector<8x512xf32> to vector<8x496xf32>
    %14 = tpu.concatenate %12, %13 in 1 : vector<8x16xf32>, vector<8x496xf32> -> vector<8x512xf32>
    %15 = vector.extract_strided_slice %0 {offsets = [1, 0], sizes = [1, 512], strides = [1, 1]} : vector<9x512xf32> to vector<1x512xf32>
    %16 = vector.broadcast %15 : vector<1x512xf32> to vector<8x512xf32>
    %17 = arith.mulf %14, %16 : vector<8x512xf32>
    %c1 = arith.constant 1 : index
    %c0_8 = arith.constant 0 : index
    %c0_9 = arith.constant 0 : index
    %18 = vector.load %arg3[%c1, %c0_8, %c0_9] : memref<9x8x8xf32, #tpu.memory_space<vmem>>, vector<1x8x8xf32>
    %19 = vector.shape_cast %18 : vector<1x8x8xf32> to vector<8x8xf32>
    %cst_10 = arith.constant dense<0.000000e+00> : vector<8x512xf32>
    %20 = tpu.matmul %19, %17, %cst_10 {dimension_numbers = #tpu.dot_dimension_numbers<[1], [0], [0], [1], [0, 0, 1, 1], [], []>} : vector<8x8xf32>, vector<8x512xf32>, vector<8x512xf32> -> vector<8x512xf32>
    %21 = arith.addf %11, %20 : vector<8x512xf32>
    %22 = vector.extract_strided_slice %1 {offsets = [0, 497], sizes = [8, 15], strides = [1, 1]} : vector<8x512xf32> to vector<8x15xf32>
    %23 = vector.extract_strided_slice %1 {offsets = [0, 0], sizes = [8, 497], strides = [1, 1]} : vector<8x512xf32> to vector<8x497xf32>
    %24 = tpu.concatenate %22, %23 in 1 : vector<8x15xf32>, vector<8x497xf32> -> vector<8x512xf32>
    %25 = vector.extract_strided_slice %0 {offsets = [2, 0], sizes = [1, 512], strides = [1, 1]} : vector<9x512xf32> to vector<1x512xf32>
    %26 = vector.broadcast %25 : vector<1x512xf32> to vector<8x512xf32>
    %27 = arith.mulf %24, %26 : vector<8x512xf32>
    %c2 = arith.constant 2 : index
    %c0_11 = arith.constant 0 : index
    %c0_12 = arith.constant 0 : index
    %28 = vector.load %arg3[%c2, %c0_11, %c0_12] : memref<9x8x8xf32, #tpu.memory_space<vmem>>, vector<1x8x8xf32>
    %29 = vector.shape_cast %28 : vector<1x8x8xf32> to vector<8x8xf32>
    %cst_13 = arith.constant dense<0.000000e+00> : vector<8x512xf32>
    %30 = tpu.matmul %29, %27, %cst_13 {dimension_numbers = #tpu.dot_dimension_numbers<[1], [0], [0], [1], [0, 0, 1, 1], [], []>} : vector<8x8xf32>, vector<8x512xf32>, vector<8x512xf32> -> vector<8x512xf32>
    %31 = arith.addf %21, %30 : vector<8x512xf32>
    %32 = vector.extract_strided_slice %1 {offsets = [0, 511], sizes = [8, 1], strides = [1, 1]} : vector<8x512xf32> to vector<8x1xf32>
    %33 = vector.extract_strided_slice %1 {offsets = [0, 0], sizes = [8, 511], strides = [1, 1]} : vector<8x512xf32> to vector<8x511xf32>
    %34 = tpu.concatenate %32, %33 in 1 : vector<8x1xf32>, vector<8x511xf32> -> vector<8x512xf32>
    %35 = vector.extract_strided_slice %0 {offsets = [3, 0], sizes = [1, 512], strides = [1, 1]} : vector<9x512xf32> to vector<1x512xf32>
    %36 = vector.broadcast %35 : vector<1x512xf32> to vector<8x512xf32>
    %37 = arith.mulf %34, %36 : vector<8x512xf32>
    %c3 = arith.constant 3 : index
    %c0_14 = arith.constant 0 : index
    %c0_15 = arith.constant 0 : index
    %38 = vector.load %arg3[%c3, %c0_14, %c0_15] : memref<9x8x8xf32, #tpu.memory_space<vmem>>, vector<1x8x8xf32>
    %39 = vector.shape_cast %38 : vector<1x8x8xf32> to vector<8x8xf32>
    %cst_16 = arith.constant dense<0.000000e+00> : vector<8x512xf32>
    %40 = tpu.matmul %39, %37, %cst_16 {dimension_numbers = #tpu.dot_dimension_numbers<[1], [0], [0], [1], [0, 0, 1, 1], [], []>} : vector<8x8xf32>, vector<8x512xf32>, vector<8x512xf32> -> vector<8x512xf32>
    %41 = arith.addf %31, %40 : vector<8x512xf32>
    %c4 = arith.constant 4 : index
    %c0_17 = arith.constant 0 : index
    %c0_18 = arith.constant 0 : index
    %42 = vector.load %arg3[%c4, %c0_17, %c0_18] : memref<9x8x8xf32, #tpu.memory_space<vmem>>, vector<1x8x8xf32>
    %43 = vector.shape_cast %42 : vector<1x8x8xf32> to vector<8x8xf32>
    %cst_19 = arith.constant dense<0.000000e+00> : vector<8x512xf32>
    %44 = tpu.matmul %43, %1, %cst_19 {dimension_numbers = #tpu.dot_dimension_numbers<[1], [0], [0], [1], [0, 0, 1, 1], [], []>} : vector<8x8xf32>, vector<8x512xf32>, vector<8x512xf32> -> vector<8x512xf32>
    %45 = arith.addf %41, %44 : vector<8x512xf32>
    %46 = vector.extract_strided_slice %1 {offsets = [0, 1], sizes = [8, 511], strides = [1, 1]} : vector<8x512xf32> to vector<8x511xf32>
    %47 = vector.extract_strided_slice %1 {offsets = [0, 0], sizes = [8, 1], strides = [1, 1]} : vector<8x512xf32> to vector<8x1xf32>
    %48 = tpu.concatenate %46, %47 in 1 : vector<8x511xf32>, vector<8x1xf32> -> vector<8x512xf32>
    %49 = vector.extract_strided_slice %0 {offsets = [5, 0], sizes = [1, 512], strides = [1, 1]} : vector<9x512xf32> to vector<1x512xf32>
    %50 = vector.broadcast %49 : vector<1x512xf32> to vector<8x512xf32>
    %51 = arith.mulf %48, %50 : vector<8x512xf32>
    %c5 = arith.constant 5 : index
    %c0_20 = arith.constant 0 : index
    %c0_21 = arith.constant 0 : index
    %52 = vector.load %arg3[%c5, %c0_20, %c0_21] : memref<9x8x8xf32, #tpu.memory_space<vmem>>, vector<1x8x8xf32>
    %53 = vector.shape_cast %52 : vector<1x8x8xf32> to vector<8x8xf32>
    %cst_22 = arith.constant dense<0.000000e+00> : vector<8x512xf32>
    %54 = tpu.matmul %53, %51, %cst_22 {dimension_numbers = #tpu.dot_dimension_numbers<[1], [0], [0], [1], [0, 0, 1, 1], [], []>} : vector<8x8xf32>, vector<8x512xf32>, vector<8x512xf32> -> vector<8x512xf32>
    %55 = arith.addf %45, %54 : vector<8x512xf32>
    %56 = vector.extract_strided_slice %1 {offsets = [0, 15], sizes = [8, 497], strides = [1, 1]} : vector<8x512xf32> to vector<8x497xf32>
    %57 = vector.extract_strided_slice %1 {offsets = [0, 0], sizes = [8, 15], strides = [1, 1]} : vector<8x512xf32> to vector<8x15xf32>
    %58 = tpu.concatenate %56, %57 in 1 : vector<8x497xf32>, vector<8x15xf32> -> vector<8x512xf32>
    %59 = vector.extract_strided_slice %0 {offsets = [6, 0], sizes = [1, 512], strides = [1, 1]} : vector<9x512xf32> to vector<1x512xf32>
    %60 = vector.broadcast %59 : vector<1x512xf32> to vector<8x512xf32>
    %61 = arith.mulf %58, %60 : vector<8x512xf32>
    %c6 = arith.constant 6 : index
    %c0_23 = arith.constant 0 : index
    %c0_24 = arith.constant 0 : index
    %62 = vector.load %arg3[%c6, %c0_23, %c0_24] : memref<9x8x8xf32, #tpu.memory_space<vmem>>, vector<1x8x8xf32>
    %63 = vector.shape_cast %62 : vector<1x8x8xf32> to vector<8x8xf32>
    %cst_25 = arith.constant dense<0.000000e+00> : vector<8x512xf32>
    %64 = tpu.matmul %63, %61, %cst_25 {dimension_numbers = #tpu.dot_dimension_numbers<[1], [0], [0], [1], [0, 0, 1, 1], [], []>} : vector<8x8xf32>, vector<8x512xf32>, vector<8x512xf32> -> vector<8x512xf32>
    %65 = arith.addf %55, %64 : vector<8x512xf32>
    %66 = vector.extract_strided_slice %1 {offsets = [0, 16], sizes = [8, 496], strides = [1, 1]} : vector<8x512xf32> to vector<8x496xf32>
    %67 = vector.extract_strided_slice %1 {offsets = [0, 0], sizes = [8, 16], strides = [1, 1]} : vector<8x512xf32> to vector<8x16xf32>
    %68 = tpu.concatenate %66, %67 in 1 : vector<8x496xf32>, vector<8x16xf32> -> vector<8x512xf32>
    %69 = vector.extract_strided_slice %0 {offsets = [7, 0], sizes = [1, 512], strides = [1, 1]} : vector<9x512xf32> to vector<1x512xf32>
    %70 = vector.broadcast %69 : vector<1x512xf32> to vector<8x512xf32>
    %71 = arith.mulf %68, %70 : vector<8x512xf32>
    %c7 = arith.constant 7 : index
    %c0_26 = arith.constant 0 : index
    %c0_27 = arith.constant 0 : index
    %72 = vector.load %arg3[%c7, %c0_26, %c0_27] : memref<9x8x8xf32, #tpu.memory_space<vmem>>, vector<1x8x8xf32>
    %73 = vector.shape_cast %72 : vector<1x8x8xf32> to vector<8x8xf32>
    %cst_28 = arith.constant dense<0.000000e+00> : vector<8x512xf32>
    %74 = tpu.matmul %73, %71, %cst_28 {dimension_numbers = #tpu.dot_dimension_numbers<[1], [0], [0], [1], [0, 0, 1, 1], [], []>} : vector<8x8xf32>, vector<8x512xf32>, vector<8x512xf32> -> vector<8x512xf32>
    %75 = arith.addf %65, %74 : vector<8x512xf32>
    %76 = vector.extract_strided_slice %1 {offsets = [0, 17], sizes = [8, 495], strides = [1, 1]} : vector<8x512xf32> to vector<8x495xf32>
    %77 = vector.extract_strided_slice %1 {offsets = [0, 0], sizes = [8, 17], strides = [1, 1]} : vector<8x512xf32> to vector<8x17xf32>
    %78 = tpu.concatenate %76, %77 in 1 : vector<8x495xf32>, vector<8x17xf32> -> vector<8x512xf32>
    %79 = vector.extract_strided_slice %0 {offsets = [8, 0], sizes = [1, 512], strides = [1, 1]} : vector<9x512xf32> to vector<1x512xf32>
    %80 = vector.broadcast %79 : vector<1x512xf32> to vector<8x512xf32>
    %81 = arith.mulf %78, %80 : vector<8x512xf32>
    %c8 = arith.constant 8 : index
    %c0_29 = arith.constant 0 : index
    %c0_30 = arith.constant 0 : index
    %82 = vector.load %arg3[%c8, %c0_29, %c0_30] : memref<9x8x8xf32, #tpu.memory_space<vmem>>, vector<1x8x8xf32>
    %83 = vector.shape_cast %82 : vector<1x8x8xf32> to vector<8x8xf32>
    %cst_31 = arith.constant dense<0.000000e+00> : vector<8x512xf32>
    %84 = tpu.matmul %83, %81, %cst_31 {dimension_numbers = #tpu.dot_dimension_numbers<[1], [0], [0], [1], [0, 0, 1, 1], [], []>} : vector<8x8xf32>, vector<8x512xf32>, vector<8x512xf32> -> vector<8x512xf32>
    %85 = arith.addf %75, %84 : vector<8x512xf32>
    %86 = vector.broadcast %2 : vector<8x1xf32> to vector<8x512xf32>
    %87 = arith.addf %85, %86 : vector<8x512xf32>
    %cst_32 = arith.constant 0.000000e+00 : f32
    %88 = vector.broadcast %cst_32 : f32 to vector<8x512xf32>
    %89 = arith.maximumf %87, %88 : vector<8x512xf32>
    %c0_33 = arith.constant 0 : index
    %c0_34 = arith.constant 0 : index
    %90 = vector.load %arg6[%c0_33, %c0_34] : memref<8x1xf32, #tpu.memory_space<vmem>>, vector<8x1xf32>
    %91 = vector.extract_strided_slice %89 {offsets = [0, 495], sizes = [8, 17], strides = [1, 1]} : vector<8x512xf32> to vector<8x17xf32>
    %92 = vector.extract_strided_slice %89 {offsets = [0, 0], sizes = [8, 495], strides = [1, 1]} : vector<8x512xf32> to vector<8x495xf32>
    %93 = tpu.concatenate %91, %92 in 1 : vector<8x17xf32>, vector<8x495xf32> -> vector<8x512xf32>
    %94 = vector.extract_strided_slice %0 {offsets = [0, 0], sizes = [1, 512], strides = [1, 1]} : vector<9x512xf32> to vector<1x512xf32>
    %95 = vector.broadcast %94 : vector<1x512xf32> to vector<8x512xf32>
    %96 = arith.mulf %93, %95 : vector<8x512xf32>
    %c0_35 = arith.constant 0 : index
    %c0_36 = arith.constant 0 : index
    %c0_37 = arith.constant 0 : index
    %97 = vector.load %arg5[%c0_35, %c0_36, %c0_37] : memref<9x8x8xf32, #tpu.memory_space<vmem>>, vector<1x8x8xf32>
    %98 = vector.shape_cast %97 : vector<1x8x8xf32> to vector<8x8xf32>
    %cst_38 = arith.constant dense<0.000000e+00> : vector<8x512xf32>
    %99 = tpu.matmul %98, %96, %cst_38 {dimension_numbers = #tpu.dot_dimension_numbers<[1], [0], [0], [1], [0, 0, 1, 1], [], []>} : vector<8x8xf32>, vector<8x512xf32>, vector<8x512xf32> -> vector<8x512xf32>
    %100 = vector.extract_strided_slice %89 {offsets = [0, 496], sizes = [8, 16], strides = [1, 1]} : vector<8x512xf32> to vector<8x16xf32>
    %101 = vector.extract_strided_slice %89 {offsets = [0, 0], sizes = [8, 496], strides = [1, 1]} : vector<8x512xf32> to vector<8x496xf32>
    %102 = tpu.concatenate %100, %101 in 1 : vector<8x16xf32>, vector<8x496xf32> -> vector<8x512xf32>
    %103 = vector.extract_strided_slice %0 {offsets = [1, 0], sizes = [1, 512], strides = [1, 1]} : vector<9x512xf32> to vector<1x512xf32>
    %104 = vector.broadcast %103 : vector<1x512xf32> to vector<8x512xf32>
    %105 = arith.mulf %102, %104 : vector<8x512xf32>
    %c1_39 = arith.constant 1 : index
    %c0_40 = arith.constant 0 : index
    %c0_41 = arith.constant 0 : index
    %106 = vector.load %arg5[%c1_39, %c0_40, %c0_41] : memref<9x8x8xf32, #tpu.memory_space<vmem>>, vector<1x8x8xf32>
    %107 = vector.shape_cast %106 : vector<1x8x8xf32> to vector<8x8xf32>
    %cst_42 = arith.constant dense<0.000000e+00> : vector<8x512xf32>
    %108 = tpu.matmul %107, %105, %cst_42 {dimension_numbers = #tpu.dot_dimension_numbers<[1], [0], [0], [1], [0, 0, 1, 1], [], []>} : vector<8x8xf32>, vector<8x512xf32>, vector<8x512xf32> -> vector<8x512xf32>
    %109 = arith.addf %99, %108 : vector<8x512xf32>
    %110 = vector.extract_strided_slice %89 {offsets = [0, 497], sizes = [8, 15], strides = [1, 1]} : vector<8x512xf32> to vector<8x15xf32>
    %111 = vector.extract_strided_slice %89 {offsets = [0, 0], sizes = [8, 497], strides = [1, 1]} : vector<8x512xf32> to vector<8x497xf32>
    %112 = tpu.concatenate %110, %111 in 1 : vector<8x15xf32>, vector<8x497xf32> -> vector<8x512xf32>
    %113 = vector.extract_strided_slice %0 {offsets = [2, 0], sizes = [1, 512], strides = [1, 1]} : vector<9x512xf32> to vector<1x512xf32>
    %114 = vector.broadcast %113 : vector<1x512xf32> to vector<8x512xf32>
    %115 = arith.mulf %112, %114 : vector<8x512xf32>
    %c2_43 = arith.constant 2 : index
    %c0_44 = arith.constant 0 : index
    %c0_45 = arith.constant 0 : index
    %116 = vector.load %arg5[%c2_43, %c0_44, %c0_45] : memref<9x8x8xf32, #tpu.memory_space<vmem>>, vector<1x8x8xf32>
    %117 = vector.shape_cast %116 : vector<1x8x8xf32> to vector<8x8xf32>
    %cst_46 = arith.constant dense<0.000000e+00> : vector<8x512xf32>
    %118 = tpu.matmul %117, %115, %cst_46 {dimension_numbers = #tpu.dot_dimension_numbers<[1], [0], [0], [1], [0, 0, 1, 1], [], []>} : vector<8x8xf32>, vector<8x512xf32>, vector<8x512xf32> -> vector<8x512xf32>
    %119 = arith.addf %109, %118 : vector<8x512xf32>
    %120 = vector.extract_strided_slice %89 {offsets = [0, 511], sizes = [8, 1], strides = [1, 1]} : vector<8x512xf32> to vector<8x1xf32>
    %121 = vector.extract_strided_slice %89 {offsets = [0, 0], sizes = [8, 511], strides = [1, 1]} : vector<8x512xf32> to vector<8x511xf32>
    %122 = tpu.concatenate %120, %121 in 1 : vector<8x1xf32>, vector<8x511xf32> -> vector<8x512xf32>
    %123 = vector.extract_strided_slice %0 {offsets = [3, 0], sizes = [1, 512], strides = [1, 1]} : vector<9x512xf32> to vector<1x512xf32>
    %124 = vector.broadcast %123 : vector<1x512xf32> to vector<8x512xf32>
    %125 = arith.mulf %122, %124 : vector<8x512xf32>
    %c3_47 = arith.constant 3 : index
    %c0_48 = arith.constant 0 : index
    %c0_49 = arith.constant 0 : index
    %126 = vector.load %arg5[%c3_47, %c0_48, %c0_49] : memref<9x8x8xf32, #tpu.memory_space<vmem>>, vector<1x8x8xf32>
    %127 = vector.shape_cast %126 : vector<1x8x8xf32> to vector<8x8xf32>
    %cst_50 = arith.constant dense<0.000000e+00> : vector<8x512xf32>
    %128 = tpu.matmul %127, %125, %cst_50 {dimension_numbers = #tpu.dot_dimension_numbers<[1], [0], [0], [1], [0, 0, 1, 1], [], []>} : vector<8x8xf32>, vector<8x512xf32>, vector<8x512xf32> -> vector<8x512xf32>
    %129 = arith.addf %119, %128 : vector<8x512xf32>
    %c4_51 = arith.constant 4 : index
    %c0_52 = arith.constant 0 : index
    %c0_53 = arith.constant 0 : index
    %130 = vector.load %arg5[%c4_51, %c0_52, %c0_53] : memref<9x8x8xf32, #tpu.memory_space<vmem>>, vector<1x8x8xf32>
    %131 = vector.shape_cast %130 : vector<1x8x8xf32> to vector<8x8xf32>
    %cst_54 = arith.constant dense<0.000000e+00> : vector<8x512xf32>
    %132 = tpu.matmul %131, %89, %cst_54 {dimension_numbers = #tpu.dot_dimension_numbers<[1], [0], [0], [1], [0, 0, 1, 1], [], []>} : vector<8x8xf32>, vector<8x512xf32>, vector<8x512xf32> -> vector<8x512xf32>
    %133 = arith.addf %129, %132 : vector<8x512xf32>
    %134 = vector.extract_strided_slice %89 {offsets = [0, 1], sizes = [8, 511], strides = [1, 1]} : vector<8x512xf32> to vector<8x511xf32>
    %135 = vector.extract_strided_slice %89 {offsets = [0, 0], sizes = [8, 1], strides = [1, 1]} : vector<8x512xf32> to vector<8x1xf32>
    %136 = tpu.concatenate %134, %135 in 1 : vector<8x511xf32>, vector<8x1xf32> -> vector<8x512xf32>
    %137 = vector.extract_strided_slice %0 {offsets = [5, 0], sizes = [1, 512], strides = [1, 1]} : vector<9x512xf32> to vector<1x512xf32>
    %138 = vector.broadcast %137 : vector<1x512xf32> to vector<8x512xf32>
    %139 = arith.mulf %136, %138 : vector<8x512xf32>
    %c5_55 = arith.constant 5 : index
    %c0_56 = arith.constant 0 : index
    %c0_57 = arith.constant 0 : index
    %140 = vector.load %arg5[%c5_55, %c0_56, %c0_57] : memref<9x8x8xf32, #tpu.memory_space<vmem>>, vector<1x8x8xf32>
    %141 = vector.shape_cast %140 : vector<1x8x8xf32> to vector<8x8xf32>
    %cst_58 = arith.constant dense<0.000000e+00> : vector<8x512xf32>
    %142 = tpu.matmul %141, %139, %cst_58 {dimension_numbers = #tpu.dot_dimension_numbers<[1], [0], [0], [1], [0, 0, 1, 1], [], []>} : vector<8x8xf32>, vector<8x512xf32>, vector<8x512xf32> -> vector<8x512xf32>
    %143 = arith.addf %133, %142 : vector<8x512xf32>
    %144 = vector.extract_strided_slice %89 {offsets = [0, 15], sizes = [8, 497], strides = [1, 1]} : vector<8x512xf32> to vector<8x497xf32>
    %145 = vector.extract_strided_slice %89 {offsets = [0, 0], sizes = [8, 15], strides = [1, 1]} : vector<8x512xf32> to vector<8x15xf32>
    %146 = tpu.concatenate %144, %145 in 1 : vector<8x497xf32>, vector<8x15xf32> -> vector<8x512xf32>
    %147 = vector.extract_strided_slice %0 {offsets = [6, 0], sizes = [1, 512], strides = [1, 1]} : vector<9x512xf32> to vector<1x512xf32>
    %148 = vector.broadcast %147 : vector<1x512xf32> to vector<8x512xf32>
    %149 = arith.mulf %146, %148 : vector<8x512xf32>
    %c6_59 = arith.constant 6 : index
    %c0_60 = arith.constant 0 : index
    %c0_61 = arith.constant 0 : index
    %150 = vector.load %arg5[%c6_59, %c0_60, %c0_61] : memref<9x8x8xf32, #tpu.memory_space<vmem>>, vector<1x8x8xf32>
    %151 = vector.shape_cast %150 : vector<1x8x8xf32> to vector<8x8xf32>
    %cst_62 = arith.constant dense<0.000000e+00> : vector<8x512xf32>
    %152 = tpu.matmul %151, %149, %cst_62 {dimension_numbers = #tpu.dot_dimension_numbers<[1], [0], [0], [1], [0, 0, 1, 1], [], []>} : vector<8x8xf32>, vector<8x512xf32>, vector<8x512xf32> -> vector<8x512xf32>
    %153 = arith.addf %143, %152 : vector<8x512xf32>
    %154 = vector.extract_strided_slice %89 {offsets = [0, 16], sizes = [8, 496], strides = [1, 1]} : vector<8x512xf32> to vector<8x496xf32>
    %155 = vector.extract_strided_slice %89 {offsets = [0, 0], sizes = [8, 16], strides = [1, 1]} : vector<8x512xf32> to vector<8x16xf32>
    %156 = tpu.concatenate %154, %155 in 1 : vector<8x496xf32>, vector<8x16xf32> -> vector<8x512xf32>
    %157 = vector.extract_strided_slice %0 {offsets = [7, 0], sizes = [1, 512], strides = [1, 1]} : vector<9x512xf32> to vector<1x512xf32>
    %158 = vector.broadcast %157 : vector<1x512xf32> to vector<8x512xf32>
    %159 = arith.mulf %156, %158 : vector<8x512xf32>
    %c7_63 = arith.constant 7 : index
    %c0_64 = arith.constant 0 : index
    %c0_65 = arith.constant 0 : index
    %160 = vector.load %arg5[%c7_63, %c0_64, %c0_65] : memref<9x8x8xf32, #tpu.memory_space<vmem>>, vector<1x8x8xf32>
    %161 = vector.shape_cast %160 : vector<1x8x8xf32> to vector<8x8xf32>
    %cst_66 = arith.constant dense<0.000000e+00> : vector<8x512xf32>
    %162 = tpu.matmul %161, %159, %cst_66 {dimension_numbers = #tpu.dot_dimension_numbers<[1], [0], [0], [1], [0, 0, 1, 1], [], []>} : vector<8x8xf32>, vector<8x512xf32>, vector<8x512xf32> -> vector<8x512xf32>
    %163 = arith.addf %153, %162 : vector<8x512xf32>
    %164 = vector.extract_strided_slice %89 {offsets = [0, 17], sizes = [8, 495], strides = [1, 1]} : vector<8x512xf32> to vector<8x495xf32>
    %165 = vector.extract_strided_slice %89 {offsets = [0, 0], sizes = [8, 17], strides = [1, 1]} : vector<8x512xf32> to vector<8x17xf32>
    %166 = tpu.concatenate %164, %165 in 1 : vector<8x495xf32>, vector<8x17xf32> -> vector<8x512xf32>
    %167 = vector.extract_strided_slice %0 {offsets = [8, 0], sizes = [1, 512], strides = [1, 1]} : vector<9x512xf32> to vector<1x512xf32>
    %168 = vector.broadcast %167 : vector<1x512xf32> to vector<8x512xf32>
    %169 = arith.mulf %166, %168 : vector<8x512xf32>
    %c8_67 = arith.constant 8 : index
    %c0_68 = arith.constant 0 : index
    %c0_69 = arith.constant 0 : index
    %170 = vector.load %arg5[%c8_67, %c0_68, %c0_69] : memref<9x8x8xf32, #tpu.memory_space<vmem>>, vector<1x8x8xf32>
    %171 = vector.shape_cast %170 : vector<1x8x8xf32> to vector<8x8xf32>
    %cst_70 = arith.constant dense<0.000000e+00> : vector<8x512xf32>
    %172 = tpu.matmul %171, %169, %cst_70 {dimension_numbers = #tpu.dot_dimension_numbers<[1], [0], [0], [1], [0, 0, 1, 1], [], []>} : vector<8x8xf32>, vector<8x512xf32>, vector<8x512xf32> -> vector<8x512xf32>
    %173 = arith.addf %163, %172 : vector<8x512xf32>
    %174 = vector.broadcast %90 : vector<8x1xf32> to vector<8x512xf32>
    %175 = arith.addf %173, %174 : vector<8x512xf32>
    %cst_71 = arith.constant 0.000000e+00 : f32
    %176 = vector.broadcast %cst_71 : f32 to vector<8x512xf32>
    %177 = arith.maximumf %175, %176 : vector<8x512xf32>
    %c0_72 = arith.constant 0 : index
    %c0_73 = arith.constant 0 : index
    %178 = vector.load %arg7[%c0_72, %c0_73] : memref<8x512xf32, #tpu.memory_space<vmem>>, vector<8x512xf32>
    tpu.vector_store %arg7[%c0_72, %c0_73], %177 {strides = array<i32>} : memref<8x512xf32, #tpu.memory_space<vmem>>, vector<8x512xf32>,
    return
  }
  func.func @transform_0(%arg0: i32) -> (i32, i32) {
    %c0_i32 = arith.constant 0 : i32
    %c0_i32_0 = arith.constant 0 : i32
    return %c0_i32, %arg0 : i32, i32
  }
  func.func @transform_1(%arg0: i32) -> (i32, i32) {
    %c0_i32 = arith.constant 0 : i32
    %c0_i32_0 = arith.constant 0 : i32
    %c0_i32_1 = arith.constant 0 : i32
    return %c0_i32, %c0_i32_0 : i32, i32
  }
  func.func @transform_2(%arg0: i32) -> (i32, i32, i32) {
    %c0_i32 = arith.constant 0 : i32
    %c0_i32_0 = arith.constant 0 : i32
    %c0_i32_1 = arith.constant 0 : i32
    %c0_i32_2 = arith.constant 0 : i32
    return %c0_i32, %c0_i32_0, %c0_i32_1 : i32, i32, i32
  }
  func.func @transform_3(%arg0: i32) -> (i32, i32) {
    %c0_i32 = arith.constant 0 : i32
    %c0_i32_0 = arith.constant 0 : i32
    %c0_i32_1 = arith.constant 0 : i32
    return %c0_i32, %c0_i32_0 : i32, i32
  }
  func.func @transform_4(%arg0: i32) -> (i32, i32, i32) {
    %c0_i32 = arith.constant 0 : i32
    %c0_i32_0 = arith.constant 0 : i32
    %c0_i32_1 = arith.constant 0 : i32
    %c0_i32_2 = arith.constant 0 : i32
    return %c0_i32, %c0_i32_0, %c0_i32_1 : i32, i32, i32
  }
  func.func @transform_5(%arg0: i32) -> (i32, i32) {
    %c0_i32 = arith.constant 0 : i32
    %c0_i32_0 = arith.constant 0 : i32
    %c0_i32_1 = arith.constant 0 : i32
    return %c0_i32, %c0_i32_0 : i32, i32
  }
  func.func @transform_6(%arg0: i32) -> (i32, i32) {
    %c0_i32 = arith.constant 0 : i32
    %c0_i32_0 = arith.constant 0 : i32
    return %c0_i32, %arg0 : i32, i32
  }
}

</mosaic_0001>

<bundles_post_ra>
// kernel: tpu_custom_call.1
= control target key start
LH: loop header
LB: loop body
LE: loop exit
PB: predicated region body
PF: predicated region fallthrough
CT: control target
= control target key end

     0   :  { %6 = vsyncpa [#allocation3], 0  ;;  %s137_s0 = inlined_call_operand.hbm [shape: f32[8,256], index: 0, kind: input, shape index: {}]   ;;  %s138_s1 = inlined_call_operand.hbm [shape: f32[8,256], index: 1, kind: output, shape index: {}]  }
   0x1   :  { %7 = vsyncpa [#allocation4], 0  ;;  %s100_s6 = smov [#allocation2]   ;;  %s52_s10 = scalar_lea.hbm %s137_s0, 256 }
   0x2   :  { %s14_s7 = sshll.u32 %s100_s6, 4  ;;  %p53_p0 = scmp.ne.s32.totalorder %s137_s0, %s52_s10  ;;  %s15_s7 = int_to_ptr.vmem [resolvable:$true] %s14_s7 }
   0x3   :  { %p56_p1 = scmp.lt.u32.totalorder %s52_s10, %s137_s0 }
   0x5   :  { %p58_p2 = pnand %p56_p1, %p53_p0 }
   0x7   :  { %61 = shalt.err (!%p58_p2)
}
   0x8   :  { %s62_s15 = scalar_lea.vmem %s15_s7, 256  ;;  %p67_p4 = scmp.lt.s32.totalorder %s15_s7, %s15_s7 }
   0x9   :  { %p63_p3 = scmp.ne.s32.totalorder %s15_s7, %s62_s15  ;;  %p68_p5 = scmp.lt.s32.totalorder %s62_s15, %s62_s15 }
   0xb   :  { %p69_p6 = por %p68_p5, %p67_p4 }
   0xd   :  { %p70_p7 = pnand %p69_p6, %p63_p3 }
   0xf   :  { %73 = shalt.err (!%p70_p7)
}
  0x10   :  { %17 = dma.hbm_to_vmem [thread:$0]  %s137_s0, 256, %s15_s7, [#allocation3]  }
  0x11   :  { %96 = dma.done.wait [#allocation3], 256  }
  0x12   :  { %97 = vsyncadd [#allocation3], 4294967040  ;;  %v21_v0 = vld [vmem:[#allocation2] sm:$0xff]  ;;  %s101_s18 = smov 17   ;;  %v22_v1 = vld [vmem:[#allocation2 + $0x8] sm:$0xff]  ;;  %v27_v2 = vlaneseq  ;;  %s102_s19 = smov [#allocation5]  }
  0x13   :  { %23 = vrot.lane.b32.xlu0 %v21_v0, %s101_s18  ;;  %s40_s20 = sshll.u32 %s102_s19, 4  ;;  %s41_s20 = int_to_ptr.vmem [resolvable:$true] %s40_s20 }
  0x14   :  { %v28_v3 = vand.u32 127, %v27_v2  ;;  %s74_s0 = scalar_lea.vmem %s41_s20, 256  ;;  %p79_p9 = scmp.lt.s32.totalorder %s41_s20, %s41_s20 }
  0x15   :  { %p75_p8 = scmp.ne.s32.totalorder %s41_s20, %s74_s0  ;;  %p80_p10 = scmp.lt.s32.totalorder %s74_s0, %s74_s0 }
  0x16   :  { %vm29_vm0 = vcmp.lt.s32.totalorder %v28_v3, 17 }
  0x17   :  { %25 = vrot.lane.b32.xlu0 %v22_v1, %s101_s18  ;;  %p81_p11 = por %p80_p10, %p79_p9 }
  0x19   :  { %p82_p12 = pnand %p81_p11, %p75_p8 }
  0x85   :  { %v24_v4 = vpop.permute.xlu0 %23 }
  0x89   :  { %v26_v5 = vpop.permute.xlu0 %25 }
  0x8a   :  { %v30_v6 = vsel %vm29_vm0, %v24_v4, %v26_v5  ;;  %v31_v7 = vsel %vm29_vm0, %v26_v5, %v24_v4 }
  0x8b   :  { %32 = vst [vmem:[#allocation5] sm:$0xff] %v31_v7  ;;  %33 = vst [vmem:[#allocation5 + $0x8] sm:$0xff] %v30_v6 }
  0x8c   :  { %85 = shalt.err (!%p82_p12)
}
  0x8d   :  { %s86_s23 = scalar_lea.hbm %s138_s1, 256 }
  0x8e   :  { %p87_p13 = scmp.ne.s32.totalorder %s138_s1, %s86_s23  ;;  %p90_p0 = scmp.lt.u32.totalorder %s86_s23, %s138_s1 }
  0x90   :  { %p92_p1 = pnand %p90_p0, %p87_p13 }
  0x92   :  { %95 = shalt.err (!%p92_p1)
}
  0x93   :  { %43 = dma.vmem_to_hbm [thread:$0]  %s41_s20, 256, %s138_s1, [#allocation4]  }
  0x94   :  { %98 = dma.done.wait [#allocation4], 256  }
  0x95   :  { %99 = vsyncadd [#allocation4], 4294967040 }
  0x96   :  { %47 = vsyncpa [#allocation3], 1 }
  0x97   :  { %48 = vsyncpa [#allocation4], 1 }

// kernel: _double_conv_impl.1
= control target key start
LH: loop header
LB: loop body
LE: loop exit
PB: predicated region body
PF: predicated region fallthrough
CT: control target
= control target key end

     0   :  { %v3383_v2 = vmov 0.0   ;;  %s3384_s25 = smov 16   ;;  %s3385_s30 = smov 17   ;;  %v3392_v5 = vmov 0   ;;  %v58_v7 = vlaneseq  ;;  %vm88_vm0 = vcmask 130048   ;;  %s3997_s0 = inlined_call_operand.vmem [shape: f32[8,512], index: 0, kind: input, shape index: {}]   ;;  %s3998_s3 = inlined_call_operand.vmem [shape: f32[8,1], index: 3, kind: input, shape index: {}]   ;;  %s3999_s1 = inlined_call_operand.vmem [shape: f32[9,512], index: 1, kind: input, shape index: {}]   ;;  %s4000_s2 = inlined_call_operand.vmem [shape: f32[9,8,8], index: 2, kind: input, shape index: {}]   ;;  %s4001_s5 = inlined_call_operand.vmem [shape: f32[8,1], index: 5, kind: input, shape index: {}]   ;;  %s4002_s4 = inlined_call_operand.vmem [shape: f32[9,8,8], index: 4, kind: input, shape index: {}]   ;;  %s4003_s6 = inlined_call_operand.vmem [shape: f32[8,512], index: 6, kind: output, shape index: {}]  }
   0x1   :  { %v3431_v0 = vld [vmem:[%s3997_s0 + $0x18] sm:$0xff]  ;;  %v3436_v1 = vld [vmem:[%s3997_s0 + $0x8] sm:$0xff]  ;;  %187 = vmatprep.mubr.f32.mxu0 %v3383_v2  ;;  %258 = vmatprep.mubr.f32.mxu1 %v3383_v2  ;;  %v3447_v3 = vld [vmem:[%s3997_s0 + $0x10] sm:$0xff]  ;;  %s3387_s7 = smov 1   ;;  %s3388_s8 = smov 127   ;;  %vm119_vm1 = vcmask 64512  }
   0x2   :  { %79 = vrot.lane.b32.xlu0 %v3431_v0, %s3384_s25  ;;  %84 = vrot.lane.b32.xlu1 %v3436_v1, %s3384_s25  ;;  %v3452_v4 = vld [vmem:[%s3997_s0] sm:$0xff]  ;;  %s3386_s0 = smov 15   ;;  %s3389_s9 = smov 113   ;;  %v3517_v8 = vshrl.u32 %v58_v7, 7  ;;  %v3522_v9 = vld [vmem:[%s3999_s1 + $0x18] sm:$0xff]  ;;  %vm49_vm2 = vcmask 138240  }
   0x3   :  { %s3390_s10 = smov 112   ;;  %s3391_s11 = smov 111   ;;  %3382 = vset.pattern.permute.xlu0 %v3392_v5  ;;  %v35_v6 = vld [vmem:[%s3998_s3] sm:$0xff]  ;;  %v3528_v11 = vld [vmem:[%s3999_s1 + $0x8] sm:$0xff]  ;;  %v3538_v13 = vld [vmem:[%s3999_s1 + $0x10] sm:$0xff]  ;;  %vm419_vm3 = vcmask 121856  }
   0x4   :  { %v99_v10 = vsub.s32 1, %v3517_v8  ;;  %v3533_v12 = vld [vmem:[%s3999_s1] sm:$0xff]  ;;  %v60_v30 = vsub.s32 0, %v3517_v8  ;;  %v3252_v31 = vld [vmem:[%s4000_s2 + $0x8] sm:$0xff]  ;;  %v430_v48 = vsub.s32 2, %v3517_v8  ;;  %v619_v7 = vsub.s32 3, %v3517_v8 }
   0x5   :  { %v78_v49 = vld [vmem:[%s4000_s2] sm:$0xff]  ;;  %vm608_vm4 = vcmask 7168   ;;  %vm947_vm5 = vcmask 1039360   ;;  %vm1136_vm6 = vcmask 924672   ;;  %vm1325_vm7 = vcmask 916480  }
   0x6   :  { %86 = vrot.lane.b32.xlu1 %v3447_v3, %s3384_s25  ;;  %82 = vrot.lane.b32.xlu0 %v3452_v4, %s3384_s25  ;;  %v3541_v16 = vrot.slane %v3522_v9, %v99_v10  ;;  %v3544_v17 = vrot.slane %v3528_v11, %v99_v10  ;;  %v3547_v18 = vrot.slane %v3533_v12, %v99_v10  ;;  %vm1514_vm8 = vcmask 908288  }
   0x7   :  { %v3550_v19 = vrot.slane %v3538_v13, %v99_v10  ;;  %v3567_v34 = vrot.slane %v3522_v9, %v60_v30  ;;  %v3570_v35 = vrot.slane %v3528_v11, %v60_v30  ;;  %v3573_v36 = vrot.slane %v3538_v13, %v60_v30  ;;  %v3257_v10 = vld [vmem:[%s4000_s2 + $0x10] sm:$0xff] }
   0x8   :  { %v3576_v37 = vrot.slane %v3533_v12, %v60_v30  ;;  %v3595_v52 = vrot.slane %v3522_v9, %v430_v48  ;;  %v3598_v53 = vrot.slane %v3528_v11, %v430_v48  ;;  %v3601_v54 = vrot.slane %v3538_v13, %v430_v48 }
   0x9   :  { %v3604_v55 = vrot.slane %v3533_v12, %v430_v48 }
   0xa   :  { %43 = vrot.lane.b32.xlu1 %v3452_v4, %s3385_s30  ;;  %37 = vrot.lane.b32.xlu0 %v3431_v0, %s3385_s30 }
   0xe   :  { %47 = vrot.lane.b32.xlu1 %v3447_v3, %s3385_s30  ;;  %45 = vrot.lane.b32.xlu0 %v3436_v1, %s3385_s30 }
  0x12   :  { %413 = vrot.lane.b32.xlu1 %v3452_v4, %s3386_s0  ;;  %410 = vrot.lane.b32.xlu0 %v3431_v0, %s3386_s0 }
  0x16   :  { %417 = vrot.lane.b32.xlu1 %v3447_v3, %s3386_s0  ;;  %415 = vrot.lane.b32.xlu0 %v3436_v1, %s3386_s0 }
  0x1a   :  { %602 = vrot.lane.b32.xlu1 %v3452_v4, %s3387_s7  ;;  %599 = vrot.lane.b32.xlu0 %v3431_v0, %s3387_s7 }
  0x1e   :  { %606 = vrot.lane.b32.xlu1 %v3447_v3, %s3387_s7  ;;  %604 = vrot.lane.b32.xlu0 %v3436_v1, %s3387_s7 }
  0x22   :  { %939 = vrot.lane.b32.xlu0 %v3452_v4, %s3388_s8  ;;  %941 = vrot.lane.b32.xlu1 %v3436_v1, %s3388_s8 }
  0x26   :  { %943 = vrot.lane.b32.xlu0 %v3447_v3, %s3388_s8  ;;  %945 = vrot.lane.b32.xlu1 %v3431_v0, %s3388_s8 }
  0x2a   :  { %1128 = vrot.lane.b32.xlu0 %v3452_v4, %s3389_s9  ;;  %1130 = vrot.lane.b32.xlu1 %v3436_v1, %s3389_s9 }
  0x2e   :  { %1132 = vrot.lane.b32.xlu0 %v3447_v3, %s3389_s9  ;;  %1134 = vrot.lane.b32.xlu1 %v3431_v0, %s3389_s9 }
  0x32   :  { %1317 = vrot.lane.b32.xlu0 %v3452_v4, %s3390_s10  ;;  %1319 = vrot.lane.b32.xlu1 %v3436_v1, %s3390_s10 }
  0x36   :  { %1321 = vrot.lane.b32.xlu0 %v3447_v3, %s3390_s10  ;;  %1323 = vrot.lane.b32.xlu1 %v3431_v0, %s3390_s10 }
  0x3a   :  { %1506 = vrot.lane.b32.xlu0 %v3452_v4, %s3391_s11  ;;  %1508 = vrot.lane.b32.xlu1 %v3436_v1, %s3391_s11 }
  0x3e   :  { %1510 = vrot.lane.b32.xlu0 %v3447_v3, %s3391_s11  ;;  %1512 = vrot.lane.b32.xlu1 %v3431_v0, %s3391_s11 }
  0x42   :  { %1697 = vperm.xlu0 %3382, %v35_v6  }
  0x74   :  { %v80_v14 = vpop.permute.xlu0 %79  ;;  %v85_v15 = vpop.permute.xlu1 %84 }
  0x78   :  { %v87_v20 = vpop.permute.xlu1 %86  ;;  %v83_v21 = vpop.permute.xlu0 %82 }
  0x79   :  { %v90_v22 = vsel %vm88_vm0, %v85_v15, %v87_v20  ;;  %v96_v23 = vsel %vm88_vm0, %v80_v14, %v83_v21  ;;  %v91_v24 = vsel %vm88_vm0, %v87_v20, %v80_v14  ;;  %v89_v25 = vsel %vm88_vm0, %v83_v21, %v85_v15 }
  0x7a   :  { %v116_v26 = vmul.f32 %v3541_v16, %v91_v24  ;;  %v114_v27 = vmul.f32 %v3544_v17, %v89_v25  ;;  %v113_v28 = vmul.f32 %v3547_v18, %v96_v23  ;;  %v115_v29 = vmul.f32 %v3550_v19, %v90_v22 }
  0x7b   :  { %v3623_v20 = vrot.slane %v3522_v9, %v619_v7  ;;  %v3626_v21 = vrot.slane %v3528_v11, %v619_v7  ;;  %v3629_v22 = vrot.slane %v3538_v13, %v619_v7  ;;  %v3632_v23 = vrot.slane %v3533_v12, %v619_v7 }
  0x7c   :  { %194 = vmatprep.subr.mxu1 %v116_v26  ;;  %v44_v32 = vpop.permute.xlu1 %43  ;;  %123 = vmatprep.subr.mxu0 %v114_v27  ;;  %v38_v33 = vpop.permute.xlu0 %37 }
  0x7d   :  { %124 = vmatpush1.msra.mxu0 %v113_v28  ;;  %195 = vmatpush1.msra.mxu1 %v115_v29  ;;  %v57_v38 = vsel %vm49_vm2, %v38_v33, %v44_v32 }
  0x7e   :  { %3253 = vmatmul.mubr.msk.f32.vlgmr.msra.gmra.mrb[0].mxu0 %vm119_vm1, %v3252_v31  ;;  %3254 = vmatmul.mubr.msk.f32.vlgmr.msra.gmra.mrb[0].mxu1 %vm119_vm1, %v3252_v31  ;;  %v74_v47 = vmul.f32 %v3576_v37, %v57_v38 }
  0x7f   :  { %332 = vmatprep.mubr.f32.mxu0 %v3383_v2  ;;  %403 = vmatprep.mubr.f32.mxu1 %v3383_v2 }
  0x80   :  { %v48_v39 = vpop.permute.xlu1 %47  ;;  %v46_v40 = vpop.permute.xlu0 %45 }
  0x81   :  { %v52_v41 = vsel %vm49_vm2, %v48_v39, %v38_v33  ;;  %v50_v42 = vsel %vm49_vm2, %v44_v32, %v46_v40  ;;  %v51_v43 = vsel %vm49_vm2, %v46_v40, %v48_v39  ;;  %v959_v33 = vsub.s32 5, %v3517_v8  ;;  %v3260_v39 = vld [vmem:[%s4000_s2 + $0x18] sm:$0xff] }
  0x82   :  { %v77_v44 = vmul.f32 %v3567_v34, %v52_v41  ;;  %v75_v45 = vmul.f32 %v3570_v35, %v50_v42  ;;  %v76_v46 = vmul.f32 %v3573_v36, %v51_v43 }
  0x83   :  { %v3651_v42 = vrot.slane %v3528_v11, %v959_v33  ;;  %v3654_v43 = vrot.slane %v3522_v9, %v959_v33 }
  0x84   :  { %v414_v50 = vpop.permute.xlu1 %413  ;;  %268 = vmatprep.subr.mxu0 %v75_v45  ;;  %339 = vmatprep.subr.mxu1 %v77_v44  ;;  %v411_v51 = vpop.permute.xlu0 %410  ;;  %v3657_v44 = vrot.slane %v3533_v12, %v959_v33  ;;  %v3660_v45 = vrot.slane %v3538_v13, %v959_v33 }
  0x85   :  { %269 = vmatpush1.msra.mxu0 %v74_v47  ;;  %340 = vmatpush1.msra.mxu1 %v76_v46  ;;  %v427_v56 = vsel %vm419_vm3, %v411_v51, %v414_v50 }
  0x86   :  { %3255 = vmatmul.mubr.msk.f32.vlgmr.msra.gmra.mrb[0].mxu0 %vm119_vm1, %v78_v49  ;;  %3256 = vmatmul.mubr.msk.f32.vlgmr.msra.gmra.mrb[0].mxu1 %vm119_vm1, %v78_v49  ;;  %v444_v6 = vmul.f32 %v3604_v55, %v427_v56  ;;  %v1148_v56 = vsub.s32 6, %v3517_v8 }
  0x87   :  { %517 = vmatprep.mubr.f32.mxu0 %v3383_v2  ;;  %588 = vmatprep.mubr.f32.mxu1 %v3383_v2 }
  0x88   :  { %v418_v57 = vpop.permute.xlu1 %417  ;;  %v416_v58 = vpop.permute.xlu0 %415 }
  0x89   :  { %v422_v59 = vsel %vm419_vm3, %v418_v57, %v411_v51  ;;  %v420_v60 = vsel %vm419_vm3, %v414_v50, %v416_v58  ;;  %v421_v61 = vsel %vm419_vm3, %v416_v58, %v418_v57  ;;  %v3263_v58 = vld [vmem:[%s4000_s2 + $0x20] sm:$0xff] }
  0x8a   :  { %v447_v62 = vmul.f32 %v3595_v52, %v422_v59  ;;  %v445_v63 = vmul.f32 %v3598_v53, %v420_v60  ;;  %v446_v5 = vmul.f32 %v3601_v54, %v421_v61  ;;  %v3686_v61 = vrot.slane %v3522_v9, %v1148_v56 }
  0x8c   :  { %v603_v14 = vpop.permute.xlu1 %602  ;;  %453 = vmatprep.subr.mxu0 %v445_v63  ;;  %524 = vmatprep.subr.mxu1 %v447_v62  ;;  %v600_v15 = vpop.permute.xlu0 %599  ;;  %v3689_v62 = vrot.slane %v3533_v12, %v1148_v56  ;;  %v3692_v63 = vrot.slane %v3538_v13, %v1148_v56 }
  0x8d   :  { %454 = vmatpush1.msra.mxu0 %v444_v6  ;;  %525 = vmatpush1.msra.mxu1 %v446_v5  ;;  %v616_v24 = vsel %vm608_vm4, %v600_v15, %v603_v14 }
  0x8e   :  { %3258 = vmatmul.mubr.msk.f32.vlgmr.msra.gmra.mrb[0].mxu0 %vm119_vm1, %v3257_v10  ;;  %3259 = vmatmul.mubr.msk.f32.vlgmr.msra.gmra.mrb[0].mxu1 %vm119_vm1, %v3257_v10  ;;  %v633_v38 = vmul.f32 %v3632_v23, %v616_v24 }
  0x8f   :  { %706 = vmatprep.mubr.f32.mxu0 %v3383_v2  ;;  %777 = vmatprep.mubr.f32.mxu1 %v3383_v2 }
  0x90   :  { %v607_v25 = vpop.permute.xlu1 %606  ;;  %v605_v26 = vpop.permute.xlu0 %604 }
  0x91   :  { %v611_v27 = vsel %vm608_vm4, %v607_v25, %v600_v15  ;;  %v609_v28 = vsel %vm608_vm4, %v603_v14, %v605_v26  ;;  %v610_v29 = vsel %vm608_vm4, %v605_v26, %v607_v25  ;;  %v1337_v26 = vsub.s32 7, %v3517_v8 }
  0x92   :  { %v636_v30 = vmul.f32 %v3623_v20, %v611_v27  ;;  %v634_v31 = vmul.f32 %v3626_v21, %v609_v28  ;;  %v635_v32 = vmul.f32 %v3629_v22, %v610_v29  ;;  %v3266_v29 = vld [vmem:[%s4000_s2 + $0x28] sm:$0xff] }
  0x93   :  { %v3714_v8 = vrot.slane %v3522_v9, %v1337_v26  ;;  %v3717_v33 = vrot.slane %v3533_v12, %v1337_v26 }
  0x94   :  { %642 = vmatprep.subr.mxu0 %v634_v31  ;;  %713 = vmatprep.subr.mxu1 %v636_v30  ;;  %v940_v40 = vpop.permute.xlu0 %939  ;;  %v942_v41 = vpop.permute.xlu1 %941 }
  0x95   :  { %643 = vmatpush1.msra.mxu0 %v633_v38  ;;  %714 = vmatpush1.msra.mxu1 %v635_v32  ;;  %v948_v46 = vsel %vm947_vm5, %v940_v40, %v942_v41  ;;  %v3711_v32 = vrot.slane %v3528_v11, %v1337_v26  ;;  %v3720_v38 = vrot.slane %v3538_v13, %v1337_v26 }
  0x96   :  { %3261 = vmatmul.mubr.msk.f32.vlgmr.msra.gmra.mrb[0].mxu0 %vm119_vm1, %v3260_v39  ;;  %3262 = vmatmul.mubr.msk.f32.vlgmr.msra.gmra.mrb[0].mxu1 %vm119_vm1, %v3260_v39 }
  0x97   :  { %793 = vmatprep.subr.mxu0 %v3436_v1  ;;  %864 = vmatprep.subr.mxu1 %v3431_v0 }
  0x98   :  { %v944_v47 = vpop.permute.xlu0 %943  ;;  %v946_v48 = vpop.permute.xlu1 %945  ;;  %794 = vmatpush1.msra.mxu0 %v3452_v4  ;;  %857 = vmatprep.mubr.f32.mxu0 %v3383_v2  ;;  %v973_v4 = vmul.f32 %v3657_v44, %v948_v46 }
  0x99   :  { %v949_v49 = vsel %vm947_vm5, %v942_v41, %v944_v47  ;;  %v950_v50 = vsel %vm947_vm5, %v944_v47, %v946_v48  ;;  %v956_v51 = vsel %vm947_vm5, %v946_v48, %v940_v40  ;;  %865 = vmatpush1.msra.mxu1 %v3447_v3  ;;  %928 = vmatprep.mubr.f32.mxu1 %v3383_v2 }
  0x9a   :  { %v974_v0 = vmul.f32 %v3651_v42, %v949_v49  ;;  %v976_v1 = vmul.f32 %v3654_v43, %v956_v51  ;;  %v975_v57 = vmul.f32 %v3660_v45, %v950_v50  ;;  %v3683_v3 = vrot.slane %v3528_v11, %v1148_v56  ;;  %v3269_v49 = vld [vmem:[%s4000_s2 + $0x30] sm:$0xff]  ;;  %v3750_v56 = vld [vmem:[%s3999_s1 + $0x20] ss:$0 sm:$0xff] }
  0x9c   :  { %982 = vmatprep.subr.mxu0 %v974_v0  ;;  %v1129_v59 = vpop.permute.xlu0 %1128  ;;  %v1131_v60 = vpop.permute.xlu1 %1130  ;;  %1053 = vmatprep.subr.mxu1 %v976_v1  ;;  %v3740_v0 = vld [vmem:[%s3999_s1 + $0x28] ss:$0 sm:$0xff]  ;;  %v3745_v1 = vld [vmem:[%s3999_s1 + $0x38] ss:$0 sm:$0xff] }
  0x9d   :  { %v1137_v5 = vsel %vm1136_vm6, %v1129_v59, %v1131_v60 }
  0x9e   :  { %3264 = vmatmul.mubr.msk.f32.vlgmr.msra.gmra.mrb[0].mxu0 %vm119_vm1, %v3263_v58  ;;  %3265 = vmatmul.mubr.msk.f32.vlgmr.msra.gmra.mrb[0].mxu1 %vm119_vm1, %v3263_v58  ;;  %v1162_v27 = vmul.f32 %v3689_v62, %v1137_v5  ;;  %v3756_v58 = vld [vmem:[%s3999_s1 + $0x30] ss:$0 sm:$0xff] }
  0x9f   :  { %983 = vmatpush1.msra.mxu0 %v973_v4  ;;  %1054 = vmatpush1.msra.mxu1 %v975_v57 }
  0xa0   :  { %v1133_v6 = vpop.permute.xlu0 %1132  ;;  %v1135_v7 = vpop.permute.xlu1 %1134  ;;  %1046 = vmatprep.mubr.f32.mxu0 %v3383_v2  ;;  %1117 = vmatprep.mubr.f32.mxu1 %v3383_v2 }
  0xa1   :  { %v1138_v10 = vsel %vm1136_vm6, %v1131_v60, %v1133_v6  ;;  %v1139_v14 = vsel %vm1136_vm6, %v1133_v6, %v1135_v7  ;;  %v1145_v15 = vsel %vm1136_vm6, %v1135_v7, %v1129_v59 }
  0xa2   :  { %v1163_v24 = vmul.f32 %v3683_v3, %v1138_v10  ;;  %v1165_v25 = vmul.f32 %v3686_v61, %v1145_v15  ;;  %v1164_v28 = vmul.f32 %v3692_v63, %v1139_v14 }
  0xa4   :  { %1171 = vmatprep.subr.mxu0 %v1163_v24  ;;  %v1318_v30 = vpop.permute.xlu0 %1317  ;;  %v1320_v31 = vpop.permute.xlu1 %1319  ;;  %1242 = vmatprep.subr.mxu1 %v1165_v25  ;;  %v3272_v24 = vld [vmem:[%s4000_s2 + $0x38] sm:$0xff]  ;;  %v3279_v25 = vld [vmem:[%s4000_s2 + $0x40] sm:$0xff] }
  0xa5   :  { %v1326_v39 = vsel %vm1325_vm7, %v1318_v30, %v1320_v31 }
  0xa6   :  { %3267 = vmatmul.mubr.msk.f32.vlgmr.msra.gmra.mrb[0].mxu0 %vm119_vm1, %v3266_v29  ;;  %3268 = vmatmul.mubr.msk.f32.vlgmr.msra.gmra.mrb[0].mxu1 %vm119_vm1, %v3266_v29  ;;  %v1351_v47 = vmul.f32 %v3717_v33, %v1326_v39 }
  0xa7   :  { %1172 = vmatpush1.msra.mxu0 %v1162_v27  ;;  %1243 = vmatpush1.msra.mxu1 %v1164_v28 }
  0xa8   :  { %v1322_v40 = vpop.permute.xlu0 %1321  ;;  %v1324_v41 = vpop.permute.xlu1 %1323  ;;  %1235 = vmatprep.mubr.f32.mxu0 %v3383_v2  ;;  %1306 = vmatprep.mubr.f32.mxu1 %v3383_v2 }
  0xa9   :  { %v1327_v11 = vsel %vm1325_vm7, %v1320_v31, %v1322_v40  ;;  %v1328_v9 = vsel %vm1325_vm7, %v1322_v40, %v1324_v41  ;;  %v1334_v12 = vsel %vm1325_vm7, %v1324_v41, %v1318_v30 }
  0xaa   :  { %v1352_v46 = vmul.f32 %v3711_v32, %v1327_v11  ;;  %v1354_v13 = vmul.f32 %v3714_v8, %v1334_v12  ;;  %v1353_v48 = vmul.f32 %v3720_v38, %v1328_v9 }
  0xac   :  { %1360 = vmatprep.subr.mxu0 %v1352_v46  ;;  %v1507_v50 = vpop.permute.xlu0 %1506  ;;  %v1509_v51 = vpop.permute.xlu1 %1508  ;;  %1431 = vmatprep.subr.mxu1 %v1354_v13  ;;  %v1708_v13 = vld [vmem:[%s4001_s5] sm:$0xff] }
  0xad   :  { %v1515_v4 = vsel %vm1514_vm8, %v1507_v50, %v1509_v51 }
  0xae   :  { %3270 = vmatmul.mubr.msk.f32.vlgmr.msra.gmra.mrb[0].mxu0 %vm119_vm1, %v3269_v49  ;;  %3271 = vmatmul.mubr.msk.f32.vlgmr.msra.gmra.mrb[0].mxu1 %vm119_vm1, %v3269_v49  ;;  %v1540_v14 = vmul.f32 %v3750_v56, %v1515_v4 }
  0xaf   :  { %1361 = vmatpush1.msra.mxu0 %v1351_v47  ;;  %1432 = vmatpush1.msra.mxu1 %v1353_v48 }
  0xb0   :  { %v1511_v57 = vpop.permute.xlu0 %1510  ;;  %v1513_v59 = vpop.permute.xlu1 %1512  ;;  %1424 = vmatprep.mubr.f32.mxu0 %v3383_v2  ;;  %1495 = vmatprep.mubr.f32.mxu1 %v3383_v2 }
  0xb1   :  { %v1516_v60 = vsel %vm1514_vm8, %v1509_v51, %v1511_v57  ;;  %v1517_v5 = vsel %vm1514_vm8, %v1511_v57, %v1513_v59  ;;  %v1523_v6 = vsel %vm1514_vm8, %v1513_v59, %v1507_v50 }
  0xb2   :  { %v1541_v7 = vmul.f32 %v3740_v0, %v1516_v60  ;;  %v1543_v10 = vmul.f32 %v3745_v1, %v1523_v6  ;;  %v1542_v15 = vmul.f32 %v3756_v58, %v1517_v5 }
  0xb4   :  { %1549 = vmatprep.subr.mxu0 %v1541_v7  ;;  %1620 = vmatprep.subr.mxu1 %v1543_v10 }
  0xb6   :  { %3273 = vmatmul.mubr.msk.f32.vlgmr.msra.gmra.mrb[0].mxu0 %vm119_vm1, %v3272_v24  ;;  %3274 = vmatmul.mubr.msk.f32.vlgmr.msra.gmra.mrb[0].mxu1 %vm119_vm1, %v3272_v24 }
  0xb7   :  { %1550 = vmatpush1.msra.mxu0 %v1540_v14  ;;  %1621 = vmatpush1.msra.mxu1 %v1542_v15  ;;  %v3282_v14 = vld [vmem:[%s4002_s4 + $0x8] sm:$0xff] }
  0xb8   :  { %1613 = vmatprep.mubr.f32.mxu0 %v3383_v2  ;;  %1684 = vmatprep.mubr.f32.mxu1 %v3383_v2 }
  0xbe   :  { %3280 = vmatmul.mubr.msk.f32.vlgmr.msra.gmra.mrb[0].mxu0 %vm119_vm1, %v3279_v25  ;;  %3281 = vmatmul.mubr.msk.f32.vlgmr.msra.gmra.mrb[0].mxu1 %vm119_vm1, %v3279_v25 }
  0xbf   :  { %1825 = vmatprep.mubr.f32.mxu0 %v3383_v2  ;;  %1896 = vmatprep.mubr.f32.mxu1 %v3383_v2 }
  0xc1   :  { %v1698_v26 = vpop.permute.xlu0 %1697 }
 0x191   :  { %v1615_v27 = vpop.f32.mrb[0].mxu0  ;;  %v1686_v28 = vpop.f32.mrb[0].mxu1 }
 0x192   :  { %v1700_v29 = vadd.f32 %v1698_v26, %v1615_v27  ;;  %v1617_v30 = vpop.f32.mrb[1].mxu0  ;;  %v1688_v31 = vpop.f32.mrb[1].mxu1  ;;  %v1702_v40 = vadd.f32 %v1698_v26, %v1686_v28 }
 0x193   :  { %v1701_v39 = vadd.f32 %v1698_v26, %v1617_v30  ;;  %v1703_v9 = vadd.f32 %v1698_v26, %v1688_v31 }
 0x194   :  { %v3781_v41 = vmax.f32 %v1700_v29, 0.0  ;;  %v3789_v12 = vmax.f32 %v1702_v40, 0.0 }
 0x195   :  { %v3783_v11 = vmax.f32 %v1701_v39, 0.0  ;;  %v3791_v46 = vmax.f32 %v1703_v9, 0.0 }
 0x196   :  { %1738 = vrot.lane.b32.xlu1 %v3781_v41, %s3384_s25 }
 0x197   :  { %1740 = vrot.lane.b32.xlu0 %v3783_v11, %s3384_s25 }
 0x19a   :  { %1742 = vrot.lane.b32.xlu1 %v3789_v12, %s3384_s25 }
 0x19b   :  { %1710 = vrot.lane.b32.xlu0 %v3791_v46, %s3385_s30 }
 0x19e   :  { %1735 = vrot.lane.b32.xlu1 %v3791_v46, %s3384_s25 }
 0x19f   :  { %1718 = vrot.lane.b32.xlu0 %v3783_v11, %s3385_s30 }
 0x1a2   :  { %1716 = vrot.lane.b32.xlu1 %v3781_v41, %s3385_s30 }
 0x1a3   :  { %2048 = vrot.lane.b32.xlu0 %v3791_v46, %s3386_s0 }
 0x1a6   :  { %1720 = vrot.lane.b32.xlu1 %v3789_v12, %s3385_s30 }
 0x1a7   :  { %2053 = vrot.lane.b32.xlu0 %v3783_v11, %s3386_s0 }
 0x1aa   :  { %2051 = vrot.lane.b32.xlu1 %v3781_v41, %s3386_s0 }
 0x1ab   :  { %2220 = vrot.lane.b32.xlu0 %v3791_v46, %s3387_s7 }
 0x1ae   :  { %2055 = vrot.lane.b32.xlu1 %v3789_v12, %s3386_s0 }
 0x1af   :  { %2225 = vrot.lane.b32.xlu0 %v3783_v11, %s3387_s7 }
 0x1b2   :  { %2223 = vrot.lane.b32.xlu1 %v3781_v41, %s3387_s7 }
 0x1b3   :  { %2543 = vrot.lane.b32.xlu0 %v3781_v41, %s3388_s8 }
 0x1b6   :  { %2227 = vrot.lane.b32.xlu1 %v3789_v12, %s3387_s7 }
 0x1b7   :  { %2547 = vrot.lane.b32.xlu0 %v3789_v12, %s3388_s8 }
 0x1ba   :  { %2545 = vrot.lane.b32.xlu1 %v3783_v11, %s3388_s8 }
 0x1bb   :  { %2715 = vrot.lane.b32.xlu0 %v3781_v41, %s3389_s9 }
 0x1be   :  { %2549 = vrot.lane.b32.xlu1 %v3791_v46, %s3388_s8 }
 0x1bf   :  { %2719 = vrot.lane.b32.xlu0 %v3789_v12, %s3389_s9 }
 0x1c2   :  { %2717 = vrot.lane.b32.xlu1 %v3783_v11, %s3389_s9 }
 0x1c3   :  { %2887 = vrot.lane.b32.xlu0 %v3781_v41, %s3390_s10 }
 0x1c6   :  { %2721 = vrot.lane.b32.xlu1 %v3791_v46, %s3389_s9 }
 0x1c7   :  { %2891 = vrot.lane.b32.xlu0 %v3789_v12, %s3390_s10 }
 0x1ca   :  { %2889 = vrot.lane.b32.xlu1 %v3783_v11, %s3390_s10 }
 0x1cb   :  { %3059 = vrot.lane.b32.xlu0 %v3781_v41, %s3391_s11 }
 0x1ce   :  { %2893 = vrot.lane.b32.xlu1 %v3791_v46, %s3390_s10 }
 0x1cf   :  { %3063 = vrot.lane.b32.xlu0 %v3789_v12, %s3391_s11 }
 0x1d2   :  { %3061 = vrot.lane.b32.xlu1 %v3783_v11, %s3391_s11 }
 0x1d3   :  { %3233 = vperm.xlu0 %3382, %v1708_v13  }
 0x1d6   :  { %3065 = vrot.lane.b32.xlu1 %v3791_v46, %s3391_s11 }
 0x208   :  { %v1739_v47 = vpop.permute.xlu1 %1738 }
 0x209   :  { %v1741_v48 = vpop.permute.xlu0 %1740 }
 0x20a   :  { %v1744_v49 = vsel %vm88_vm0, %v1739_v47, %v1741_v48 }
 0x20b   :  { %v1753_v50 = vmul.f32 %v1744_v49, %v3544_v17 }
 0x20c   :  { %v1743_v51 = vpop.permute.xlu1 %1742 }
 0x20d   :  { %v1711_v4 = vpop.permute.xlu0 %1710  ;;  %1761 = vmatprep.subr.mxu0 %v1753_v50  ;;  %v1745_v57 = vsel %vm88_vm0, %v1741_v48, %v1743_v51 }
 0x20e   :  { %v1754_v17 = vmul.f32 %v1745_v57, %v3550_v19 }
 0x210   :  { %v1736_v59 = vpop.permute.xlu1 %1735 }
 0x211   :  { %v1746_v60 = vsel %vm88_vm0, %v1743_v51, %v1736_v59  ;;  %v1751_v5 = vsel %vm88_vm0, %v1736_v59, %v1739_v47  ;;  %v1719_v6 = vpop.permute.xlu0 %1718 }
 0x212   :  { %v1752_v7 = vmul.f32 %v1751_v5, %v3547_v18  ;;  %v1755_v10 = vmul.f32 %v1746_v60, %v3541_v16 }
 0x214   :  { %1762 = vmatpush1.msra.mxu0 %v1752_v7  ;;  %1832 = vmatprep.subr.mxu1 %v1755_v10  ;;  %v1717_v15 = vpop.permute.xlu1 %1716 }
 0x215   :  { %v1722_v24 = vsel %vm49_vm2, %v1717_v15, %v1719_v6  ;;  %v1729_v25 = vsel %vm49_vm2, %v1711_v4, %v1717_v15  ;;  %v2049_v26 = vpop.permute.xlu0 %2048  ;;  %3283 = vmatmul.mubr.msk.f32.vlgmr.msra.gmra.mrb[2].mxu0 %vm119_vm1, %v3282_v14  ;;  %1833 = vmatpush1.msra.mxu1 %v1754_v17 }
 0x216   :  { %v1730_v18 = vmul.f32 %v1729_v25, %v3576_v37  ;;  %v1731_v16 = vmul.f32 %v1722_v24, %v3570_v35  ;;  %3284 = vmatmul.mubr.msk.f32.vlgmr.msra.gmra.mrb[2].mxu1 %vm119_vm1, %v3282_v14  ;;  %1970 = vmatprep.mubr.f32.mxu0 %v3383_v2  ;;  %v1734_v35 = vld [vmem:[%s4002_s4] sm:$0xff] }
 0x217   :  { %2041 = vmatprep.mubr.f32.mxu1 %v3383_v2 }
 0x218   :  { %1906 = vmatprep.subr.mxu0 %v1731_v16  ;;  %v1721_v19 = vpop.permute.xlu1 %1720 }
 0x219   :  { %v1723_v27 = vsel %vm49_vm2, %v1719_v6, %v1721_v19  ;;  %v1724_v28 = vsel %vm49_vm2, %v1721_v19, %v1711_v4  ;;  %v2054_v29 = vpop.permute.xlu0 %2053  ;;  %1907 = vmatpush1.msra.mxu0 %v1730_v18 }
 0x21a   :  { %v1732_v30 = vmul.f32 %v1723_v27, %v3573_v36  ;;  %v1733_v37 = vmul.f32 %v1724_v28, %v3567_v34 }
 0x21c   :  { %1977 = vmatprep.subr.mxu1 %v1733_v37  ;;  %v2052_v31 = vpop.permute.xlu1 %2051 }
 0x21d   :  { %v2057_v39 = vsel %vm419_vm3, %v2052_v31, %v2054_v29  ;;  %v2064_v40 = vsel %vm419_vm3, %v2049_v26, %v2052_v31  ;;  %v2221_v9 = vpop.permute.xlu0 %2220  ;;  %3285 = vmatmul.mubr.msk.f32.vlgmr.msra.gmra.mrb[2].mxu0 %vm119_vm1, %v1734_v35  ;;  %1978 = vmatpush1.msra.mxu1 %v1732_v30 }
 0x21e   :  { %v2065_v13 = vmul.f32 %v2064_v40, %v3604_v55  ;;  %v2066_v36 = vmul.f32 %v2057_v39, %v3598_v53  ;;  %3286 = vmatmul.mubr.msk.f32.vlgmr.msra.gmra.mrb[2].mxu1 %vm119_vm1, %v1734_v35  ;;  %2138 = vmatprep.mubr.f32.mxu0 %v3383_v2  ;;  %v3287_v53 = vld [vmem:[%s4002_s4 + $0x10] sm:$0xff] }
 0x21f   :  { %2209 = vmatprep.mubr.f32.mxu1 %v3383_v2 }
 0x220   :  { %2074 = vmatprep.subr.mxu0 %v2066_v36  ;;  %v2056_v34 = vpop.permute.xlu1 %2055 }
 0x221   :  { %v2058_v47 = vsel %vm419_vm3, %v2054_v29, %v2056_v34  ;;  %v2059_v48 = vsel %vm419_vm3, %v2056_v34, %v2049_v26  ;;  %v2226_v49 = vpop.permute.xlu0 %2225  ;;  %2075 = vmatpush1.msra.mxu0 %v2065_v13 }
 0x222   :  { %v2067_v50 = vmul.f32 %v2058_v47, %v3601_v54  ;;  %v2068_v55 = vmul.f32 %v2059_v48, %v3595_v52 }
 0x224   :  { %2145 = vmatprep.subr.mxu1 %v2068_v55  ;;  %v2224_v51 = vpop.permute.xlu1 %2223 }
 0x225   :  { %v2229_v4 = vsel %vm608_vm4, %v2224_v51, %v2226_v49  ;;  %v2236_v57 = vsel %vm608_vm4, %v2221_v9, %v2224_v51  ;;  %v2544_v59 = vpop.permute.xlu0 %2543  ;;  %3288 = vmatmul.mubr.msk.f32.vlgmr.msra.gmra.mrb[2].mxu0 %vm119_vm1, %v3287_v53  ;;  %2146 = vmatpush1.msra.mxu1 %v2067_v50 }
 0x226   :  { %v2237_v60 = vmul.f32 %v2236_v57, %v3632_v23  ;;  %v2238_v54 = vmul.f32 %v2229_v4, %v3626_v21  ;;  %3289 = vmatmul.mubr.msk.f32.vlgmr.msra.gmra.mrb[2].mxu1 %vm119_vm1, %v3287_v53  ;;  %2310 = vmatprep.mubr.f32.mxu0 %v3383_v2  ;;  %v3290_v21 = vld [vmem:[%s4002_s4 + $0x18] sm:$0xff] }
 0x227   :  { %2381 = vmatprep.mubr.f32.mxu1 %v3383_v2 }
 0x228   :  { %2246 = vmatprep.subr.mxu0 %v2238_v54  ;;  %v2228_v52 = vpop.permute.xlu1 %2227 }
 0x229   :  { %v2230_v5 = vsel %vm608_vm4, %v2226_v49, %v2228_v52  ;;  %v2231_v6 = vsel %vm608_vm4, %v2228_v52, %v2221_v9  ;;  %v2548_v7 = vpop.permute.xlu0 %2547  ;;  %2247 = vmatpush1.msra.mxu0 %v2237_v60 }
 0x22a   :  { %v2239_v10 = vmul.f32 %v2230_v5, %v3629_v22  ;;  %v2240_v23 = vmul.f32 %v2231_v6, %v3623_v20  ;;  %2397 = vmatprep.subr.mxu0 %v3783_v11 }
 0x22c   :  { %2317 = vmatprep.subr.mxu1 %v2240_v23  ;;  %v2546_v14 = vpop.permute.xlu1 %2545 }
 0x22d   :  { %v2552_v17 = vsel %vm947_vm5, %v2546_v14, %v2548_v7  ;;  %v2716_v15 = vpop.permute.xlu0 %2715  ;;  %3291 = vmatmul.mubr.msk.f32.vlgmr.msra.gmra.mrb[2].mxu0 %vm119_vm1, %v3290_v21  ;;  %2318 = vmatpush1.msra.mxu1 %v2239_v10  ;;  %v2551_v22 = vsel %vm947_vm5, %v2544_v59, %v2546_v14 }
 0x22e   :  { %v2561_v24 = vmul.f32 %v2552_v17, %v3651_v42  ;;  %2398 = vmatpush1.msra.mxu0 %v3781_v41  ;;  %3292 = vmatmul.mubr.msk.f32.vlgmr.msra.gmra.mrb[2].mxu1 %vm119_vm1, %v3290_v21  ;;  %v2560_v26 = vmul.f32 %v2551_v22, %v3657_v44 }
 0x22f   :  { %2468 = vmatprep.subr.mxu1 %v3791_v46  ;;  %2461 = vmatprep.mubr.f32.mxu0 %v3383_v2  ;;  %v3293_v46 = vld [vmem:[%s4002_s4 + $0x20] sm:$0xff] }
 0x230   :  { %2469 = vmatpush1.msra.mxu1 %v3789_v12  ;;  %2569 = vmatprep.subr.mxu0 %v2561_v24  ;;  %v2550_v20 = vpop.permute.xlu1 %2549 }
 0x231   :  { %v2559_v11 = vsel %vm947_vm5, %v2550_v20, %v2544_v59  ;;  %v2720_v25 = vpop.permute.xlu0 %2719  ;;  %2532 = vmatprep.mubr.f32.mxu1 %v3383_v2  ;;  %v2553_v42 = vsel %vm947_vm5, %v2548_v7, %v2550_v20 }
 0x232   :  { %v2563_v41 = vmul.f32 %v2559_v11, %v3654_v43  ;;  %v2562_v18 = vmul.f32 %v2553_v42, %v3660_v45 }
 0x234   :  { %2640 = vmatprep.subr.mxu1 %v2563_v41  ;;  %v2718_v12 = vpop.permute.xlu1 %2717 }
 0x235   :  { %v2724_v16 = vsel %vm1136_vm6, %v2718_v12, %v2720_v25  ;;  %v2888_v19 = vpop.permute.xlu0 %2887  ;;  %3294 = vmatmul.mubr.msk.f32.vlgmr.msra.gmra.mrb[2].mxu0 %vm119_vm1, %v3293_v46  ;;  %v2723_v44 = vsel %vm1136_vm6, %v2716_v15, %v2718_v12 }
 0x236   :  { %v2733_v27 = vmul.f32 %v2724_v16, %v3683_v3  ;;  %2570 = vmatpush1.msra.mxu0 %v2560_v26  ;;  %3295 = vmatmul.mubr.msk.f32.vlgmr.msra.gmra.mrb[2].mxu1 %vm119_vm1, %v3293_v46  ;;  %v3296_v3 = vld [vmem:[%s4002_s4 + $0x28] sm:$0xff]  ;;  %v2732_v37 = vmul.f32 %v2723_v44, %v3689_v62 }
 0x237   :  { %2641 = vmatpush1.msra.mxu1 %v2562_v18  ;;  %2633 = vmatprep.mubr.f32.mxu0 %v3383_v2 }
 0x238   :  { %2741 = vmatprep.subr.mxu0 %v2733_v27  ;;  %v2722_v43 = vpop.permute.xlu1 %2721  ;;  %2704 = vmatprep.mubr.f32.mxu1 %v3383_v2 }
 0x239   :  { %v2731_v45 = vsel %vm1136_vm6, %v2722_v43, %v2716_v15  ;;  %v2892_v28 = vpop.permute.xlu0 %2891  ;;  %v2725_v29 = vsel %vm1136_vm6, %v2720_v25, %v2722_v43 }
 0x23a   :  { %v2735_v30 = vmul.f32 %v2731_v45, %v3686_v61  ;;  %v2734_v31 = vmul.f32 %v2725_v29, %v3692_v63 }
 0x23c   :  { %2812 = vmatprep.subr.mxu1 %v2735_v30  ;;  %v2890_v35 = vpop.permute.xlu1 %2889 }
 0x23d   :  { %v2896_v39 = vsel %vm1325_vm7, %v2890_v35, %v2892_v28  ;;  %3297 = vmatmul.mubr.msk.f32.vlgmr.msra.gmra.mrb[2].mxu0 %vm119_vm1, %v3296_v3  ;;  %v3060_v9 = vpop.permute.xlu0 %3059  ;;  %v2895_v62 = vsel %vm1325_vm7, %v2888_v19, %v2890_v35 }
 0x23e   :  { %v2905_v40 = vmul.f32 %v2896_v39, %v3711_v32  ;;  %2742 = vmatpush1.msra.mxu0 %v2732_v37  ;;  %3298 = vmatmul.mubr.msk.f32.vlgmr.msra.gmra.mrb[2].mxu1 %vm119_vm1, %v3296_v3  ;;  %v3299_v32 = vld [vmem:[%s4002_s4 + $0x30] sm:$0xff]  ;;  %v2904_v34 = vmul.f32 %v2895_v62, %v3717_v33 }
 0x23f   :  { %2813 = vmatpush1.msra.mxu1 %v2734_v31  ;;  %2805 = vmatprep.mubr.f32.mxu0 %v3383_v2 }
 0x240   :  { %2913 = vmatprep.subr.mxu0 %v2905_v40  ;;  %v2894_v61 = vpop.permute.xlu1 %2893  ;;  %2876 = vmatprep.mubr.f32.mxu1 %v3383_v2 }
 0x241   :  { %v2903_v63 = vsel %vm1325_vm7, %v2894_v61, %v2888_v19  ;;  %v2897_v13 = vsel %vm1325_vm7, %v2892_v28, %v2894_v61  ;;  %v3064_v47 = vpop.permute.xlu0 %3063 }
 0x242   :  { %v2907_v36 = vmul.f32 %v2903_v63, %v3714_v8  ;;  %v2906_v49 = vmul.f32 %v2897_v13, %v3720_v38 }
 0x244   :  { %2984 = vmatprep.subr.mxu1 %v2907_v36  ;;  %v3062_v48 = vpop.permute.xlu1 %3061 }
 0x245   :  { %v3068_v50 = vsel %vm1514_vm8, %v3062_v48, %v3064_v47  ;;  %3300 = vmatmul.mubr.msk.f32.vlgmr.msra.gmra.mrb[2].mxu0 %vm119_vm1, %v3299_v32  ;;  %v3067_v33 = vsel %vm1514_vm8, %v3060_v9, %v3062_v48 }
 0x246   :  { %v3077_v55 = vmul.f32 %v3740_v0, %v3068_v50  ;;  %2914 = vmatpush1.msra.mxu0 %v2904_v34  ;;  %3301 = vmatmul.mubr.msk.f32.vlgmr.msra.gmra.mrb[2].mxu1 %vm119_vm1, %v3299_v32  ;;  %v3302_v0 = vld [vmem:[%s4002_s4 + $0x38] sm:$0xff]  ;;  %v3076_v4 = vmul.f32 %v3750_v56, %v3067_v33 }
 0x247   :  { %2985 = vmatpush1.msra.mxu1 %v2906_v49  ;;  %2977 = vmatprep.mubr.f32.mxu0 %v3383_v2 }
 0x248   :  { %3085 = vmatprep.subr.mxu0 %v3077_v55  ;;  %v3066_v8 = vpop.permute.xlu1 %3065  ;;  %3048 = vmatprep.mubr.f32.mxu1 %v3383_v2 }
 0x249   :  { %v3075_v38 = vsel %vm1514_vm8, %v3066_v8, %v3060_v9  ;;  %v3069_v53 = vsel %vm1514_vm8, %v3064_v47, %v3066_v8 }
 0x24a   :  { %v3079_v51 = vmul.f32 %v3745_v1, %v3075_v38  ;;  %v3078_v57 = vmul.f32 %v3756_v58, %v3069_v53  ;;  %v3305_v1 = vld [vmem:[%s4002_s4 + $0x40] sm:$0xff] }
 0x24c   :  { %3156 = vmatprep.subr.mxu1 %v3079_v51 }
 0x24d   :  { %3303 = vmatmul.mubr.msk.f32.vlgmr.msra.gmra.mrb[2].mxu0 %vm119_vm1, %v3302_v0 }
 0x24e   :  { %3086 = vmatpush1.msra.mxu0 %v3076_v4  ;;  %3304 = vmatmul.mubr.msk.f32.vlgmr.msra.gmra.mrb[2].mxu1 %vm119_vm1, %v3302_v0 }
 0x24f   :  { %3157 = vmatpush1.msra.mxu1 %v3078_v57  ;;  %3149 = vmatprep.mubr.f32.mxu0 %v3383_v2 }
 0x250   :  { %3220 = vmatprep.mubr.f32.mxu1 %v3383_v2 }
 0x252   :  { %v3234_v56 = vpop.permute.xlu0 %3233 }
 0x255   :  { %3306 = vmatmul.mubr.msk.f32.vlgmr.msra.gmra.mrb[2].mxu0 %vm119_vm1, %v3305_v1 }
 0x256   :  { %3307 = vmatmul.mubr.msk.f32.vlgmr.msra.gmra.mrb[2].mxu1 %vm119_vm1, %v3305_v1 }
 0x328   :  { %v3151_v58 = vpop.f32.mrb[2].mxu0 }
 0x329   :  { %v3236_v59 = vadd.f32 %v3234_v56, %v3151_v58  ;;  %v3153_v60 = vpop.f32.mrb[3].mxu0  ;;  %v3222_v54 = vpop.f32.mrb[2].mxu1 }
 0x32a   :  { %v3237_v52 = vadd.f32 %v3234_v56, %v3153_v60  ;;  %v3238_v5 = vadd.f32 %v3234_v56, %v3222_v54  ;;  %v3224_v6 = vpop.f32.mrb[3].mxu1 }
 0x32b   :  { %v3240_v7 = vmax.f32 %v3236_v59, 0.0  ;;  %v3239_v10 = vadd.f32 %v3234_v56, %v3224_v6 }
 0x32c   :  { %v3241_v23 = vmax.f32 %v3237_v52, 0.0  ;;  %v3242_v2 = vmax.f32 %v3238_v5, 0.0 }
 0x32d   :  { %3244 = vst [vmem:[%s4003_s6] sm:$0xff] %v3240_v7  ;;  %v3243_v21 = vmax.f32 %v3239_v10, 0.0 }
 0x32e   :  { %3245 = vst [vmem:[%s4003_s6 + $0x8] sm:$0xff] %v3241_v23  ;;  %3246 = vst [vmem:[%s4003_s6 + $0x10] sm:$0xff] %v3242_v2 }
 0x32f   :  { %3247 = vst [vmem:[%s4003_s6 + $0x18] sm:$0xff] %v3243_v21 }

</bundles_post_ra>
